<compile_context>
chip_gen: v7x
topology: tpu7x:2x2x1
jax: 0.10.0
libtpu: 0.0.40
codegen_flags: <defaults>
</compile_context>

<pallas_src>
import jax
import jax.numpy as jnp
from jax.experimental import pallas as pl
from jax.experimental.pallas import tpu as pltpu

IN_DIM = 784
H1, H1_PAD = 300, 384
H2, H2_PAD = 100, 128
OUT, OUT_PAD = 10, 128
TB = 128  # batch tile (rows fed to the MXU per grid step)


def mlp_kernel(x_ref, w1_ref, b1_ref, w2_ref, b2_ref, w3_ref, b3_ref, o_ref):
    # fc1 + relu  (MXU in bf16, f32 accumulate, f32 elementwise)
    x = x_ref[...].astype(jnp.bfloat16)
    h1 = jnp.dot(x, w1_ref[...], preferred_element_type=jnp.float32)
    h1 = jnp.maximum(h1 + b1_ref[...], 0.0)
    # fc2 + relu
    h2 = jnp.dot(h1.astype(jnp.bfloat16), w2_ref[...],
                 preferred_element_type=jnp.float32)
    h2 = jnp.maximum(h2 + b2_ref[...], 0.0)
    # fc3 (no activation)
    h3 = jnp.dot(h2.astype(jnp.bfloat16), w3_ref[...],
                 preferred_element_type=jnp.float32)
    o_ref[...] = (h3 + b3_ref[...]).astype(o_ref.dtype)


def _pad2(a, rows, cols):
    return jnp.pad(a, ((0, rows - a.shape[0]), (0, cols - a.shape[1])))


def mlp_forward(x, w1, b1, w2, b2, w3, b3, *, tb=TB):
    B = x.shape[0]
    # Zero-pad hidden/output dims to multiples of 128; zeros preserve the math.
    w1p = _pad2(w1, IN_DIM, H1_PAD).astype(jnp.bfloat16)
    b1p = _pad2(b1, 1, H1_PAD).astype(jnp.float32)
    w2p = _pad2(w2, H1_PAD, H2_PAD).astype(jnp.bfloat16)
    b2p = _pad2(b2, 1, H2_PAD).astype(jnp.float32)
    w3p = _pad2(w3, H2_PAD, OUT_PAD).astype(jnp.bfloat16)
    b3p = _pad2(b3, 1, OUT_PAD).astype(jnp.float32)

    # Pad the batch to a whole number of tiles.
    bp = pl.cdiv(B, tb) * tb
    xp = jnp.pad(x.astype(jnp.float32), ((0, bp - B), (0, 0)))

    flops = 2 * bp * (IN_DIM * H1_PAD + H1_PAD * H2_PAD + H2_PAD * OUT_PAD)
    bytes_accessed = (
        xp.size * 4 + bp * OUT_PAD * 4                       # x in, out
        + (w1p.size + w2p.size + w3p.size) * 2               # bf16 weights
        + (b1p.size + b2p.size + b3p.size) * 4               # f32 biases
    )

    out = pl.pallas_call(
        mlp_kernel,
        out_shape=jax.ShapeDtypeStruct((bp, OUT_PAD), jnp.float32),
        grid=(bp // tb,),
        in_specs=[
            pl.BlockSpec((tb, IN_DIM), lambda i: (i, 0)),      # x: tiled/pipelined
            pl.BlockSpec((IN_DIM, H1_PAD), lambda i: (0, 0)),  # weights/biases resident
            pl.BlockSpec((1, H1_PAD), lambda i: (0, 0)),
            pl.BlockSpec((H1_PAD, H2_PAD), lambda i: (0, 0)),
            pl.BlockSpec((1, H2_PAD), lambda i: (0, 0)),
            pl.BlockSpec((H2_PAD, OUT_PAD), lambda i: (0, 0)),
            pl.BlockSpec((1, OUT_PAD), lambda i: (0, 0)),
        ],
        out_specs=pl.BlockSpec((tb, OUT_PAD), lambda i: (i, 0)),
        compiler_params=pltpu.CompilerParams(
            dimension_semantics=("parallel",)),
        cost_estimate=pl.CostEstimate(
            flops=flops, transcendentals=0, bytes_accessed=bytes_accessed),
    )(xp, w1p, b1p, w2p, b2p, w3p, b3p)

    # Slice back to the real batch and the real 10 output classes.
    return out[:B, :OUT]


def init_params(key):
    # Deterministic init mimicking PyTorch's default Linear init
    # (uniform in [-1/sqrt(fan_in), 1/sqrt(fan_in)]).  Weights are stored as
    # (in_features, out_features) so the kernel computes x @ W + b directly.
    dims = [(784, 300), (300, 100), (100, 10)]
    params = []
    for (fan_in, fan_out) in dims:
        key, kw, kb = jax.random.split(key, 3)
        bound = 1.0 / (fan_in ** 0.5)
        w = jax.random.uniform(kw, (fan_in, fan_out), jnp.float32, -bound, bound)
        b = jax.random.uniform(kb, (1, fan_out), jnp.float32, -bound, bound)
        params += [w, b]
    return params


if __name__ == "__main__":
    key = jax.random.PRNGKey(0)
    key, kx = jax.random.split(key)

    B = 8  # small batch for the self-test (kernel is designed for TB=128 tiles)
    x = jax.random.normal(kx, (B, 784), jnp.float32)

    w1, b1, w2, b2, w3, b3 = init_params(key)

    out = mlp_forward(x, w1, b1, w2, b2, w3, b3)
    out = jax.block_until_ready(out)

    # Reference in plain JAX with the same bf16-rounded weights (only the
    # in-kernel bf16 activation casts differ), so a modest tolerance suffices.
    w1r = w1.astype(jnp.bfloat16).astype(jnp.float32)
    w2r = w2.astype(jnp.bfloat16).astype(jnp.float32)
    w3r = w3.astype(jnp.bfloat16).astype(jnp.float32)
    ref = jnp.maximum(x @ w1r + b1, 0.0)
    ref = jnp.maximum(ref @ w2r + b2, 0.0)
    ref = ref @ w3r + b3

    assert out.shape == (B, 10)
    assert jnp.allclose(out, ref, atol=3e-2, rtol=3e-2), (
        float(jnp.max(jnp.abs(out - ref))))

    print("KERNEL_OK")
</pallas_src>

<mosaic_0001>
module attributes {stable_mosaic.version = 11 : i64} {
  func.func @mlp_kernel(%arg0: i32, %arg1: memref<128x784xf32, #tpu.memory_space<vmem>>, %arg2: memref<784x384xbf16, #tpu.memory_space<vmem>>, %arg3: memref<1x384xf32, #tpu.memory_space<vmem>>, %arg4: memref<384x128xbf16, #tpu.memory_space<vmem>>, %arg5: memref<1x128xf32, #tpu.memory_space<vmem>>, %arg6: memref<128x128xbf16, #tpu.memory_space<vmem>>, %arg7: memref<1x128xf32, #tpu.memory_space<vmem>>, %arg8: memref<128x128xf32, #tpu.memory_space<vmem>>) attributes {dimension_semantics = [#tpu.dimension_semantics<parallel>], iteration_bounds = array<i64: 1>, scalar_prefetch = 0 : i64, scratch_operands = 0 : i64, tpu.core_type = #tpu.core_type<tc>, window_params = [{transform_indices = @transform_0, window_bounds = array<i64: 128, 784>}, {pipeline_mode = #tpu.pipeline_mode<synchronous>, transform_indices = @transform_1, window_bounds = array<i64: 784, 384>}, {pipeline_mode = #tpu.pipeline_mode<synchronous>, transform_indices = @transform_2, window_bounds = array<i64: 1, 384>}, {pipeline_mode = #tpu.pipeline_mode<synchronous>, transform_indices = @transform_3, window_bounds = array<i64: 384, 128>}, {pipeline_mode = #tpu.pipeline_mode<synchronous>, transform_indices = @transform_4, window_bounds = array<i64: 1, 128>}, {pipeline_mode = #tpu.pipeline_mode<synchronous>, transform_indices = @transform_5, window_bounds = array<i64: 128, 128>}, {pipeline_mode = #tpu.pipeline_mode<synchronous>, transform_indices = @transform_6, window_bounds = array<i64: 1, 128>}, {transform_indices = @transform_7, window_bounds = array<i64: 128, 128>}]} {
    %c0 = arith.constant 0 : index
    %c0_0 = arith.constant 0 : index
    %0 = vector.load %arg1[%c0, %c0_0] : memref<128x784xf32, #tpu.memory_space<vmem>>, vector<128x784xf32>
    %1 = arith.truncf %0 : vector<128x784xf32> to vector<128x784xbf16>
    %c0_1 = arith.constant 0 : index
    %c0_2 = arith.constant 0 : index
    %2 = vector.load %arg2[%c0_1, %c0_2] : memref<784x384xbf16, #tpu.memory_space<vmem>>, vector<784x384xbf16>
    %cst = arith.constant dense<0.000000e+00> : vector<128x384xf32>
    %3 = tpu.matmul %1, %2, %cst {dimension_numbers = #tpu.dot_dimension_numbers<[1], [0], [0], [1], [0, 0, 1, 1], [], []>} : vector<128x784xbf16>, vector<784x384xbf16>, vector<128x384xf32> -> vector<128x384xf32>
    %c0_3 = arith.constant 0 : index
    %c0_4 = arith.constant 0 : index
    %4 = vector.load %arg3[%c0_3, %c0_4] : memref<1x384xf32, #tpu.memory_space<vmem>>, vector<1x384xf32>
    %5 = vector.broadcast %4 : vector<1x384xf32> to vector<128x384xf32>
    %6 = arith.addf %3, %5 : vector<128x384xf32>
    %cst_5 = arith.constant 0.000000e+00 : f32
    %7 = vector.broadcast %cst_5 : f32 to vector<128x384xf32>
    %8 = arith.maximumf %6, %7 : vector<128x384xf32>
    %9 = arith.truncf %8 : vector<128x384xf32> to vector<128x384xbf16>
    %c0_6 = arith.constant 0 : index
    %c0_7 = arith.constant 0 : index
    %10 = vector.load %arg4[%c0_6, %c0_7] : memref<384x128xbf16, #tpu.memory_space<vmem>>, vector<384x128xbf16>
    %cst_8 = arith.constant dense<0.000000e+00> : vector<128x128xf32>
    %11 = tpu.matmul %9, %10, %cst_8 {dimension_numbers = #tpu.dot_dimension_numbers<[1], [0], [0], [1], [0, 0, 1, 1], [], []>} : vector<128x384xbf16>, vector<384x128xbf16>, vector<128x128xf32> -> vector<128x128xf32>
    %c0_9 = arith.constant 0 : index
    %c0_10 = arith.constant 0 : index
    %12 = vector.load %arg5[%c0_9, %c0_10] : memref<1x128xf32, #tpu.memory_space<vmem>>, vector<1x128xf32>
    %13 = vector.broadcast %12 : vector<1x128xf32> to vector<128x128xf32>
    %14 = arith.addf %11, %13 : vector<128x128xf32>
    %cst_11 = arith.constant 0.000000e+00 : f32
    %15 = vector.broadcast %cst_11 : f32 to vector<128x128xf32>
    %16 = arith.maximumf %14, %15 : vector<128x128xf32>
    %17 = arith.truncf %16 : vector<128x128xf32> to vector<128x128xbf16>
    %c0_12 = arith.constant 0 : index
    %c0_13 = arith.constant 0 : index
    %18 = vector.load %arg6[%c0_12, %c0_13] : memref<128x128xbf16, #tpu.memory_space<vmem>>, vector<128x128xbf16>
    %cst_14 = arith.constant dense<0.000000e+00> : vector<128x128xf32>
    %19 = tpu.matmul %17, %18, %cst_14 {dimension_numbers = #tpu.dot_dimension_numbers<[1], [0], [0], [1], [0, 0, 1, 1], [], []>} : vector<128x128xbf16>, vector<128x128xbf16>, vector<128x128xf32> -> vector<128x128xf32>
    %c0_15 = arith.constant 0 : index
    %c0_16 = arith.constant 0 : index
    %20 = vector.load %arg7[%c0_15, %c0_16] : memref<1x128xf32, #tpu.memory_space<vmem>>, vector<1x128xf32>
    %21 = vector.broadcast %20 : vector<1x128xf32> to vector<128x128xf32>
    %22 = arith.addf %19, %21 : vector<128x128xf32>
    %c0_17 = arith.constant 0 : index
    %c0_18 = arith.constant 0 : index
    %23 = vector.load %arg8[%c0_17, %c0_18] : memref<128x128xf32, #tpu.memory_space<vmem>>, vector<128x128xf32>
    tpu.vector_store %arg8[%c0_17, %c0_18], %22 {strides = array<i32>} : memref<128x128xf32, #tpu.memory_space<vmem>>, vector<128x128xf32>,
    return
  }
  func.func @transform_0(%arg0: i32) -> (i32, i32) {
    %c0_i32 = arith.constant 0 : i32
    %c0_i32_0 = arith.constant 0 : i32
    return %arg0, %c0_i32 : i32, i32
  }
  func.func @transform_1(%arg0: i32) -> (i32, i32) {
    %c0_i32 = arith.constant 0 : i32
    %c0_i32_0 = arith.constant 0 : i32
    %c0_i32_1 = arith.constant 0 : i32
    return %c0_i32, %c0_i32_0 : i32, i32
  }
  func.func @transform_2(%arg0: i32) -> (i32, i32) {
    %c0_i32 = arith.constant 0 : i32
    %c0_i32_0 = arith.constant 0 : i32
    %c0_i32_1 = arith.constant 0 : i32
    return %c0_i32, %c0_i32_0 : i32, i32
  }
  func.func @transform_3(%arg0: i32) -> (i32, i32) {
    %c0_i32 = arith.constant 0 : i32
    %c0_i32_0 = arith.constant 0 : i32
    %c0_i32_1 = arith.constant 0 : i32
    return %c0_i32, %c0_i32_0 : i32, i32
  }
  func.func @transform_4(%arg0: i32) -> (i32, i32) {
    %c0_i32 = arith.constant 0 : i32
    %c0_i32_0 = arith.constant 0 : i32
    %c0_i32_1 = arith.constant 0 : i32
    return %c0_i32, %c0_i32_0 : i32, i32
  }
  func.func @transform_5(%arg0: i32) -> (i32, i32) {
    %c0_i32 = arith.constant 0 : i32
    %c0_i32_0 = arith.constant 0 : i32
    %c0_i32_1 = arith.constant 0 : i32
    return %c0_i32, %c0_i32_0 : i32, i32
  }
  func.func @transform_6(%arg0: i32) -> (i32, i32) {
    %c0_i32 = arith.constant 0 : i32
    %c0_i32_0 = arith.constant 0 : i32
    %c0_i32_1 = arith.constant 0 : i32
    return %c0_i32, %c0_i32_0 : i32, i32
  }
  func.func @transform_7(%arg0: i32) -> (i32, i32) {
    %c0_i32 = arith.constant 0 : i32
    %c0_i32_0 = arith.constant 0 : i32
    return %arg0, %c0_i32 : i32, i32
  }
}

</mosaic_0001>

<bundles_post_ra>
// kernel: tpu_custom_call.1
= control target key start
LH: loop header
LB: loop body
LE: loop exit
PB: predicated region body
PF: predicated region fallthrough
CT: control target
= control target key end

     0   :  { %s5043_s0 = inlined_call_operand.vmem [shape: f32[128,784], index: 0, kind: input, shape index: {}]   ;;  %s5044_s1 = inlined_call_operand.vmem [shape: bf16[784,384], index: 1, kind: input, shape index: {}]   ;;  %s5045_s2 = inlined_call_operand.vmem [shape: f32[1,384], index: 2, kind: input, shape index: {}]   ;;  %s5046_s3 = inlined_call_operand.vmem [shape: bf16[384,128], index: 3, kind: input, shape index: {}]   ;;  %s5047_s4 = inlined_call_operand.vmem [shape: f32[1,128], index: 4, kind: input, shape index: {}]   ;;  %s5048_s5 = inlined_call_operand.vmem [shape: bf16[128,128], index: 5, kind: input, shape index: {}]   ;;  %s5049_s6 = inlined_call_operand.vmem [shape: f32[1,128], index: 6, kind: input, shape index: {}]   ;;  %s5050_s7 = inlined_call_operand.hbm [shape: f32[128,128], index: 7, kind: output, shape index: {}]  }
   0x1   :  { %v3455_v0 = vld [vmem:[%s5044_s1 + $0x4] ss:$12 sps:$4 sm:$0xff]   ;;  %v3457_v1 = vld [vmem:[%s5044_s1 + $0xc8] ss:$12 sps:$4 sm:$0xff]   ;;  %v3458_v2 = vld [vmem:[%s5044_s1] ss:$12 sps:$4 sm:$0xff]  }
   0x2   :  { %1218 = vmatprep.subr.bf16.mxu0 %v3455_v0  ;;  %2944 = vmatprep.subr.bf16.mxu1 %v3457_v1  ;;  %v3459_v3 = vld [vmem:[%s5044_s1 + $0x8] ss:$12 sps:$4 sm:$0xff]   ;;  %v3462_v5 = vld [vmem:[%s5044_s1 + $0xe0] ss:$12 sps:$4 sm:$0xff]   ;;  %v3463_v6 = vld [vmem:[%s5044_s1 + $0x18] ss:$12 sps:$4 sm:$0xff]  }
   0x3   :  { %1219 = vmatpush1.bf16.msra.mxu0 %v3458_v2  ;;  %v3460_v4 = vld [vmem:[%s5044_s1 + $0x1c] ss:$12 sps:$4 sm:$0xff]   ;;  %2945 = vmatpush3.bf16.msra.mxu1 %v3459_v3  ;;  %v3464_v7 = vld [vmem:[%s5044_s1 + $0x20] ss:$12 sps:$4 sm:$0xff]   ;;  %v3467_v9 = vld [vmem:[%s5044_s1 + $0xf8] ss:$12 sps:$4 sm:$0xff]  }
   0x4   :  { %1220 = vmatprep.subr.bf16.mxu0 %v3460_v4  ;;  %2946 = vmatprep.subr.bf16.mxu1 %v3462_v5  ;;  %v3465_v8 = vld [vmem:[%s5044_s1 + $0x34] ss:$12 sps:$4 sm:$0xff]   ;;  %v3468_v10 = vld [vmem:[%s5044_s1 + $0x30] ss:$12 sps:$4 sm:$0xff]   ;;  %v3469_v11 = vld [vmem:[%s5044_s1 + $0x38] ss:$12 sps:$4 sm:$0xff]  }
   0x5   :  { %v3470_v12 = vld [vmem:[%s5044_s1 + $0x4c] ss:$12 sps:$4 sm:$0xff]   ;;  %v3472_v13 = vld [vmem:[%s5044_s1 + $0x110] ss:$12 sps:$4 sm:$0xff]   ;;  %v3473_v14 = vld [vmem:[%s5044_s1 + $0x48] ss:$12 sps:$4 sm:$0xff]  }
   0x6   :  { %v3474_v15 = vld [vmem:[%s5044_s1 + $0x50] ss:$12 sps:$4 sm:$0xff]   ;;  %v3477_v17 = vld [vmem:[%s5044_s1 + $0x128] ss:$12 sps:$4 sm:$0xff]   ;;  %v3478_v18 = vld [vmem:[%s5044_s1 + $0x60] ss:$12 sps:$4 sm:$0xff]  }
   0x7   :  { %1221 = vmatpush1.bf16.msra.mxu0 %v3463_v6  ;;  %2947 = vmatpush3.bf16.msra.mxu1 %v3464_v7  ;;  %v3475_v16 = vld [vmem:[%s5044_s1 + $0x64] ss:$12 sps:$4 sm:$0xff]   ;;  %v3479_v19 = vld [vmem:[%s5044_s1 + $0x68] ss:$12 sps:$4 sm:$0xff]   ;;  %v3482_v21 = vld [vmem:[%s5044_s1 + $0x140] ss:$12 sps:$4 sm:$0xff]  }
   0x8   :  { %1222 = vmatprep.subr.bf16.mxu0 %v3465_v8  ;;  %2948 = vmatprep.subr.bf16.mxu1 %v3467_v9  ;;  %v3480_v20 = vld [vmem:[%s5044_s1 + $0x7c] ss:$12 sps:$4 sm:$0xff]   ;;  %v3483_v22 = vld [vmem:[%s5044_s1 + $0x78] ss:$12 sps:$4 sm:$0xff]   ;;  %v3484_v23 = vld [vmem:[%s5044_s1 + $0x80] ss:$12 sps:$4 sm:$0xff]  }
   0x9   :  { %v3485_v24 = vld [vmem:[%s5044_s1 + $0x94] ss:$12 sps:$4 sm:$0xff]   ;;  %v3487_v25 = vld [vmem:[%s5044_s1 + $0x158] ss:$12 sps:$4 sm:$0xff]   ;;  %v3488_v26 = vld [vmem:[%s5044_s1 + $0x90] ss:$12 sps:$4 sm:$0xff]  }
   0xa   :  { %v3489_v27 = vld [vmem:[%s5044_s1 + $0x98] ss:$12 sps:$4 sm:$0xff]   ;;  %v3492_v29 = vld [vmem:[%s5044_s1 + $0x170] ss:$12 sps:$4 sm:$0xff]   ;;  %v3493_v30 = vld [vmem:[%s5044_s1 + $0xa8] ss:$12 sps:$4 sm:$0xff]  }
   0xb   :  { %1223 = vmatpush1.bf16.msra.mxu0 %v3468_v10  ;;  %2949 = vmatpush3.bf16.msra.mxu1 %v3469_v11  ;;  %v3490_v28 = vld [vmem:[%s5044_s1 + $0xac] ss:$12 sps:$4 sm:$0xff]   ;;  %v36_v32 = vld [vmem:[%s5043_s0 + $0x40] sm:$0xff]  ;;  %v3494_v33 = vld [vmem:[%s5044_s1 + $0xb0] ss:$12 sps:$4 sm:$0xff]  }
   0xc   :  { %1224 = vmatprep.subr.bf16.mxu0 %v3470_v12  ;;  %2950 = vmatprep.subr.bf16.mxu1 %v3472_v13  ;;  %v29_v31 = vld [vmem:[%s5043_s0 + $0x8] sm:$0xff]  ;;  %v3495_v35 = vld [vmem:[%s5044_s1 + $0xc4] ss:$12 sps:$4 sm:$0xff]   ;;  %v35_v37 = vld [vmem:[%s5043_s0 + $0x38] sm:$0xff] }
   0xd   :  { %v141_v34 = vpack.c.bf16 %v36_v32, %v29_v31  ;;  %v28_v36 = vld [vmem:[%s5043_s0] sm:$0xff]  ;;  %v43_v38 = vld [vmem:[%s5043_s0 + $0x78] sm:$0xff]  ;;  %v50_v39 = vld [vmem:[%s5043_s0 + $0xb0] sm:$0xff] }
   0xe   :  { %v3868_v40 = vpack.c.bf16 %v35_v37, %v28_v36  ;;  %v3497_v41 = vld [vmem:[%s5044_s1 + $0xc0] ss:$12 sps:$4 sm:$0xff]   ;;  %v3498_v42 = vld [vmem:[%s5044_s1 + $0xdc] ss:$12 sps:$4 sm:$0xff]   ;;  %v3876_v43 = vpack.c.bf16 %v50_v39, %v43_v38  ;;  %v3500_v44 = vld [vmem:[%s5044_s1 + $0xd8] ss:$12 sps:$4 sm:$0xff]  }
   0xf   :  { %1225 = vmatpush1.bf16.msra.mxu0 %v3473_v14  ;;  %2951 = vmatpush3.bf16.msra.mxu1 %v3474_v15  ;;  %v3501_v45 = vld [vmem:[%s5044_s1 + $0xf4] ss:$12 sps:$4 sm:$0xff]   ;;  %v49_v47 = vld [vmem:[%s5043_s0 + $0xa8] sm:$0xff]  ;;  %v3503_v51 = vld [vmem:[%s5044_s1 + $0xf0] ss:$12 sps:$4 sm:$0xff]  }
  0x10   :  { %1226 = vmatprep.subr.bf16.mxu0 %v3475_v16  ;;  %2952 = vmatprep.subr.bf16.mxu1 %v3477_v17  ;;  %v42_v46 = vld [vmem:[%s5043_s0 + $0x70] sm:$0xff]  ;;  %v57_v48 = vld [vmem:[%s5043_s0 + $0xe8] sm:$0xff]  ;;  %v64_v49 = vld [vmem:[%s5043_s0 + $0x120] sm:$0xff] }
  0x11   :  { %1702 = vmatprep.mubr.bf16.mxu1 %v141_v34  ;;  %1250 = vmatprep.mubr.bf16.mxu0 %v141_v34  ;;  %v3898_v50 = vpack.c.bf16 %v49_v47, %v42_v46  ;;  %v3504_v52 = vld [vmem:[%s5044_s1 + $0x10c] ss:$12 sps:$4 sm:$0xff]   ;;  %v3906_v53 = vpack.c.bf16 %v64_v49, %v57_v48  ;;  %v3506_v54 = vld [vmem:[%s5044_s1 + $0x108] ss:$12 sps:$4 sm:$0xff]   ;;  %v3507_v55 = vld [vmem:[%s5044_s1 + $0x124] ss:$12 sps:$4 sm:$0xff]  }
  0x12   :  { %v56_v56 = vld [vmem:[%s5043_s0 + $0xe0] sm:$0xff]  ;;  %v63_v57 = vld [vmem:[%s5043_s0 + $0x118] sm:$0xff]  ;;  %v78_v59 = vld [vmem:[%s5043_s0 + $0x190] sm:$0xff] }
  0x13   :  { %1227 = vmatpush1.bf16.msra.mxu0 %v3478_v18  ;;  %2953 = vmatpush3.bf16.msra.mxu1 %v3479_v19  ;;  %v71_v58 = vld [vmem:[%s5043_s0 + $0x158] sm:$0xff]  ;;  %v3522_v60 = vld [vmem:[%s5044_s1 + $0x248] ss:$12 sps:$4 sm:$0xff]   ;;  %v3934_v62 = vpack.c.bf16 %v63_v57, %v56_v56  ;;  %v3509_v63 = vld [vmem:[%s5044_s1 + $0x120] ss:$12 sps:$4 sm:$0xff]  }
  0x14   :  { %1228 = vmatprep.subr.bf16.mxu0 %v3480_v20  ;;  %2954 = vmatprep.subr.bf16.mxu1 %v3482_v21  ;;  %v3523_v61 = vld [vmem:[%s5044_s1 + $0x188] ss:$12 sps:$4 sm:$0xff]   ;;  %v3942_v1 = vpack.c.bf16 %v78_v59, %v71_v58  ;;  %v3527_v2 = vld [vmem:[%s5044_s1 + $0x260] ss:$12 sps:$4 sm:$0xff]   ;;  %v3512_v3 = vld [vmem:[%s5044_s1 + $0x138] ss:$12 sps:$4 sm:$0xff]  }
  0x15   :  { %v3510_v0 = vld [vmem:[%s5044_s1 + $0x13c] ss:$12 sps:$4 sm:$0xff]   ;;  %v3528_v4 = vld [vmem:[%s5044_s1 + $0x1a0] ss:$12 sps:$4 sm:$0xff]   ;;  %v70_v6 = vld [vmem:[%s5043_s0 + $0x150] sm:$0xff] }
  0x16   :  { %v3513_v5 = vld [vmem:[%s5044_s1 + $0x154] ss:$12 sps:$4 sm:$0xff]   ;;  %v77_v7 = vld [vmem:[%s5043_s0 + $0x188] sm:$0xff]  ;;  %v3532_v10 = vld [vmem:[%s5044_s1 + $0x278] ss:$12 sps:$4 sm:$0xff]  }
  0x17   :  { %1229 = vmatpush1.bf16.msra.mxu0 %v3483_v22  ;;  %2955 = vmatpush3.bf16.msra.mxu1 %v3484_v23  ;;  %v85_v8 = vld [vmem:[%s5043_s0 + $0x1c8] sm:$0xff]  ;;  %v92_v9 = vld [vmem:[%s5043_s0 + $0x200] sm:$0xff]  ;;  %v3976_v12 = vpack.c.bf16 %v77_v7, %v70_v6  ;;  %v3515_v13 = vld [vmem:[%s5044_s1 + $0x150] ss:$12 sps:$4 sm:$0xff]  }
  0x18   :  { %1230 = vmatprep.subr.bf16.mxu0 %v3485_v24  ;;  %2956 = vmatprep.subr.bf16.mxu1 %v3487_v25  ;;  %v3533_v11 = vld [vmem:[%s5044_s1 + $0x1b8] ss:$12 sps:$4 sm:$0xff]   ;;  %v3984_v15 = vpack.c.bf16 %v92_v9, %v85_v8  ;;  %v3537_v16 = vld [vmem:[%s5044_s1 + $0x290] ss:$12 sps:$4 sm:$0xff]   ;;  %v3518_v18 = vld [vmem:[%s5044_s1 + $0x168] ss:$12 sps:$4 sm:$0xff]  }
  0x19   :  { %v3516_v14 = vld [vmem:[%s5044_s1 + $0x16c] ss:$12 sps:$4 sm:$0xff]   ;;  %v3538_v17 = vld [vmem:[%s5044_s1 + $0x1d0] ss:$12 sps:$4 sm:$0xff]   ;;  %v84_v20 = vld [vmem:[%s5043_s0 + $0x1c0] sm:$0xff] }
  0x1a   :  { %v3521_v19 = vld [vmem:[%s5044_s1 + $0x184] ss:$12 sps:$4 sm:$0xff]   ;;  %v91_v21 = vld [vmem:[%s5043_s0 + $0x1f8] sm:$0xff]  ;;  %v3542_v24 = vld [vmem:[%s5044_s1 + $0x2a8] ss:$12 sps:$4 sm:$0xff]  }
  0x1b   :  { %1231 = vmatpush1.bf16.msra.mxu0 %v3488_v26  ;;  %2957 = vmatpush3.bf16.msra.mxu1 %v3489_v27  ;;  %v99_v22 = vld [vmem:[%s5043_s0 + $0x238] sm:$0xff]  ;;  %v106_v23 = vld [vmem:[%s5043_s0 + $0x270] sm:$0xff]  ;;  %v3519_v26 = vld [vmem:[%s5044_s1 + $0x180] ss:$12 sps:$4 sm:$0xff]   ;;  %v4021_v27 = vpack.c.bf16 %v91_v21, %v84_v20 }
  0x1c   :  { %1232 = vmatprep.subr.bf16.mxu0 %v3490_v28  ;;  %2958 = vmatprep.subr.bf16.mxu1 %v3492_v29  ;;  %v3543_v25 = vld [vmem:[%s5044_s1 + $0x1e8] ss:$12 sps:$4 sm:$0xff]   ;;  %v3547_v29 = vld [vmem:[%s5044_s1 + $0x2c0] ss:$12 sps:$4 sm:$0xff]   ;;  %v3524_v32 = vld [vmem:[%s5044_s1 + $0x198] ss:$12 sps:$4 sm:$0xff]  }
  0x1d   :  { %v3526_v28 = vld [vmem:[%s5044_s1 + $0x19c] ss:$12 sps:$4 sm:$0xff]   ;;  %v3548_v31 = vld [vmem:[%s5044_s1 + $0x200] ss:$12 sps:$4 sm:$0xff]   ;;  %v98_v34 = vld [vmem:[%s5043_s0 + $0x230] sm:$0xff] }
  0x1e   :  { %v113_v36 = vld [vmem:[%s5043_s0 + $0x2a8] sm:$0xff]  ;;  %v120_v37 = vld [vmem:[%s5043_s0 + $0x2e0] sm:$0xff]  ;;  %v119_v49 = vld [vmem:[%s5043_s0 + $0x2d8] sm:$0xff] }
  0x1f   :  { %1233 = vmatpush1.bf16.msra.mxu0 %v3493_v30  ;;  %2959 = vmatpush3.bf16.msra.mxu1 %v3494_v33  ;;  %v4029_v30 = vpack.c.bf16 %v106_v23, %v99_v22  ;;  %v3531_v33 = vld [vmem:[%s5044_s1 + $0x1b4] ss:$12 sps:$4 sm:$0xff]   ;;  %v3552_v38 = vld [vmem:[%s5044_s1 + $0x2d8] ss:$12 sps:$4 sm:$0xff]   ;;  %v133_v59 = vld [vmem:[%s5043_s0 + $0x348] sm:$0xff] }
  0x20   :  { %1234 = vmatprep.subr.bf16.mxu0 %v3495_v35  ;;  %3008 = vmatprep.subr.bf16.mxu1 %v3522_v60  ;;  %v105_v35 = vld [vmem:[%s5043_s0 + $0x268] sm:$0xff]  ;;  %v3553_v39 = vld [vmem:[%s5044_s1 + $0x218] ss:$12 sps:$4 sm:$0xff]   ;;  %v3551_v57 = vld [vmem:[%s5044_s1 + $0x214] ss:$12 sps:$4 sm:$0xff]  }
  0x21   :  { %v3534_v46 = vld [vmem:[%s5044_s1 + $0x1c8] ss:$12 sps:$4 sm:$0xff]   ;;  %v3541_v47 = vld [vmem:[%s5044_s1 + $0x1e4] ss:$12 sps:$4 sm:$0xff]   ;;  %v31_v60 = vld [vmem:[%s5043_s0 + $0x18] sm:$0xff] }
  0x22   :  { %1703 = vmatmul.mubr.bf16.vlgmr.msra.gmra.mrb[0].mxu1 %v3868_v40  ;;  %v112_v48 = vld [vmem:[%s5043_s0 + $0x2a0] sm:$0xff]  ;;  %v126_v58 = vld [vmem:[%s5043_s0 + $0x310] sm:$0xff]  ;;  %v45_v6 = vld [vmem:[%s5043_s0 + $0x88] sm:$0xff] }
  0x23   :  { %1235 = vmatpush1.bf16.msra.mxu0 %v3497_v41  ;;  %1710 = vmatprep.mubr.bf16.mxu1 %v3876_v43  ;;  %v4065_v41 = vpack.c.bf16 %v105_v35, %v98_v34  ;;  %v3544_v56 = vld [vmem:[%s5044_s1 + $0x1f8] ss:$12 sps:$4 sm:$0xff]   ;;  %v3586_v7 = vld [vmem:[%s5044_s1 + $0x3c8] ss:$12 sps:$4 sm:$0xff]   ;;  %v3559_v9 = vld [vmem:[%s5044_s1 + $0x240] ss:$12 sps:$4 sm:$0xff]  }
  0x24   :  { %1236 = vmatprep.subr.bf16.mxu0 %v3498_v42  ;;  %3009 = vmatpush3.bf16.msra.mxu1 %v3523_v61  ;;  %v3536_v42 = vld [vmem:[%s5044_s1 + $0x1cc] ss:$12 sps:$4 sm:$0xff]   ;;  %v38_v61 = vld [vmem:[%s5043_s0 + $0x50] sm:$0xff]  ;;  %v52_v8 = vld [vmem:[%s5043_s0 + $0xc0] sm:$0xff] }
  0x25   :  { %3010 = vmatprep.subr.bf16.mxu1 %v3527_v2  ;;  %v3554_v2 = vld [vmem:[%s5044_s1 + $0x228] ss:$12 sps:$4 sm:$0xff]   ;;  %v3592_v21 = vld [vmem:[%s5044_s1 + $0x320] ss:$12 sps:$4 sm:$0xff]   ;;  %v3596_v22 = vld [vmem:[%s5044_s1 + $0x3f8] ss:$12 sps:$4 sm:$0xff]  }
  0x26   :  { %v66_v20 = vld [vmem:[%s5043_s0 + $0x130] sm:$0xff]  ;;  %v80_v34 = vld [vmem:[%s5043_s0 + $0x1a0] sm:$0xff] }
  0x27   :  { %1237 = vmatpush1.bf16.msra.mxu0 %v3500_v44  ;;  %v4073_v44 = vpack.c.bf16 %v120_v37, %v113_v36  ;;  %v3565_v23 = vld [vmem:[%s5044_s1 + $0x270] ss:$12 sps:$4 sm:$0xff]   ;;  %v3606_v36 = vld [vmem:[%s5044_s1 + $0x428] ss:$12 sps:$4 sm:$0xff]   ;;  %v3571_v37 = vld [vmem:[%s5044_s1 + $0x2a0] ss:$12 sps:$4 sm:$0xff]  }
  0x28   :  { %1238 = vmatprep.subr.bf16.mxu0 %v3501_v45  ;;  %3011 = vmatpush3.bf16.msra.mxu1 %v3528_v4  ;;  %v3558_v45 = vld [vmem:[%s5044_s1 + $0x230] ss:$12 sps:$4 sm:$0xff]  }
  0x29   :  { %3012 = vmatprep.subr.bf16.mxu1 %v3532_v10  ;;  %v30_v4 = vld [vmem:[%s5043_s0 + $0x10] sm:$0xff] }
  0x2a   :  { %1711 = vmatmul.mubr.bf16.gmra.mrb[4].mxu1 %v3898_v50  ;;  %v3602_v35 = vld [vmem:[%s5044_s1 + $0x350] ss:$12 sps:$4 sm:$0xff]  }
  0x2b   :  { %1239 = vmatpush1.bf16.msra.mxu0 %v3503_v51  ;;  %1718 = vmatprep.mubr.bf16.mxu1 %v3906_v53  ;;  %v134_v51 = vld [vmem:[%s5043_s0 + $0x350] sm:$0xff] }
  0x2c   :  { %1240 = vmatprep.subr.bf16.mxu0 %v3504_v52  ;;  %3013 = vmatpush3.bf16.msra.mxu1 %v3533_v11  ;;  %v3539_v52 = vld [vmem:[%s5044_s1 + $0x1e0] ss:$12 sps:$4 sm:$0xff]   ;;  %v3564_v11 = vld [vmem:[%s5044_s1 + $0x25c] ss:$12 sps:$4 sm:$0xff]  }
  0x2d   :  { %3014 = vmatprep.subr.bf16.mxu1 %v3537_v16  ;;  %v3567_v16 = vld [vmem:[%s5044_s1 + $0x274] ss:$12 sps:$4 sm:$0xff]  }
  0x2f   :  { %1241 = vmatpush1.bf16.msra.mxu0 %v3506_v54  ;;  %v3546_v54 = vld [vmem:[%s5044_s1 + $0x1fc] ss:$12 sps:$4 sm:$0xff]  }
  0x30   :  { %1242 = vmatprep.subr.bf16.mxu0 %v3507_v55  ;;  %3015 = vmatpush3.bf16.msra.mxu1 %v3538_v17  ;;  %v44_v17 = vld [vmem:[%s5043_s0 + $0x80] sm:$0xff] }
  0x31   :  { %3016 = vmatprep.subr.bf16.mxu1 %v3542_v24 }
  0x32   :  { %1719 = vmatmul.mubr.bf16.gmra.mrb[8].mxu1 %v3934_v62 }
  0x33   :  { %1243 = vmatpush1.bf16.msra.mxu0 %v3509_v63  ;;  %1726 = vmatprep.mubr.bf16.mxu1 %v3942_v1  ;;  %v4135_v63 = vpack.c.bf16 %v133_v59, %v126_v58  ;;  %v3585_v58 = vld [vmem:[%s5044_s1 + $0x304] ss:$12 sps:$4 sm:$0xff]  }
  0x34   :  { %1244 = vmatprep.subr.bf16.mxu0 %v3510_v0  ;;  %3017 = vmatpush3.bf16.msra.mxu1 %v3543_v25  ;;  %v3556_v0 = vld [vmem:[%s5044_s1 + $0x22c] ss:$12 sps:$4 sm:$0xff]   ;;  %v86_v59 = vld [vmem:[%s5043_s0 + $0x1d0] sm:$0xff] }
  0x35   :  { %3018 = vmatprep.subr.bf16.mxu1 %v3547_v29  ;;  %v3570_v25 = vld [vmem:[%s5044_s1 + $0x28c] ss:$12 sps:$4 sm:$0xff]   ;;  %v3601_v29 = vld [vmem:[%s5044_s1 + $0x410] ss:$12 sps:$4 sm:$0xff]  }
  0x37   :  { %1245 = vmatpush1.bf16.msra.mxu0 %v3512_v3  ;;  %v3561_v3 = vld [vmem:[%s5044_s1 + $0x244] ss:$12 sps:$4 sm:$0xff]  }
  0x38   :  { %1246 = vmatprep.subr.bf16.mxu0 %v3513_v5  ;;  %3019 = vmatpush3.bf16.msra.mxu1 %v3548_v31  ;;  %v37_v5 = vld [vmem:[%s5043_s0 + $0x48] sm:$0xff]  ;;  %v58_v31 = vld [vmem:[%s5043_s0 + $0xf0] sm:$0xff] }
  0x39   :  { %3020 = vmatprep.subr.bf16.mxu1 %v3552_v38  ;;  %v4170_v10 = vpack.c.bf16 %v37_v5, %v30_v4  ;;  %v3588_v4 = vld [vmem:[%s5044_s1 + $0x318] ss:$12 sps:$4 sm:$0xff]   ;;  %v3595_v5 = vld [vmem:[%s5044_s1 + $0x334] ss:$12 sps:$4 sm:$0xff]  }
  0x3a   :  { %1727 = vmatmul.mubr.bf16.gmra.mrb[12].mxu1 %v3976_v12 }
  0x3b   :  { %1247 = vmatpush1.bf16.msra.mxu0 %v3515_v13  ;;  %1734 = vmatprep.mubr.bf16.mxu1 %v3984_v15  ;;  %v4178_v13 = vpack.c.bf16 %v52_v8, %v45_v6  ;;  %v100_v6 = vld [vmem:[%s5043_s0 + $0x240] sm:$0xff]  ;;  %v115_v8 = vld [vmem:[%s5043_s0 + $0x2b8] sm:$0xff] }
  0x3c   :  { %1248 = vmatprep.subr.bf16.mxu0 %v3516_v14  ;;  %3021 = vmatpush3.bf16.msra.mxu1 %v3553_v39  ;;  %v3587_v14 = vld [vmem:[%s5044_s1 + $0x308] ss:$12 sps:$4 sm:$0xff]  }
  0x3d   :  { %v3576_v39 = vld [vmem:[%s5044_s1 + $0x2bc] ss:$12 sps:$4 sm:$0xff]  }
  0x3f   :  { %1249 = vmatpush1.bf16.msra.mxu0 %v3518_v18  ;;  %v51_v18 = vld [vmem:[%s5043_s0 + $0xb8] sm:$0xff] }
  0x40   :  { %1331 = vmatprep.subr.bf16.mxu0 %v3521_v19  ;;  %v59_v19 = vld [vmem:[%s5043_s0 + $0xf8] sm:$0xff]  ;;  %v4214_v24 = vpack.c.bf16 %v51_v18, %v44_v17  ;;  %v121_v17 = vld [vmem:[%s5043_s0 + $0x2e8] sm:$0xff] }
  0x41   :  { %v129_v18 = vld [vmem:[%s5043_s0 + $0x328] sm:$0xff] }
  0x42   :  { %1251 = vmatmul.mubr.bf16.vlgmr.msra.gmra.mrb[0].mxu0 %v3868_v40  ;;  %1735 = vmatmul.mubr.bf16.gmra.mrb[16].mxu1 %v4021_v27  ;;  %v3529_v40 = vld [vmem:[%s5044_s1 + $0x1b0] ss:$12 sps:$4 sm:$0xff]  }
  0x43   :  { %1332 = vmatpush1.bf16.msra.mxu0 %v3519_v26  ;;  %1260 = vmatprep.mubr.bf16.mxu0 %v3876_v43  ;;  %v3557_v43 = vld [vmem:[%s5044_s1 + $0x2f0] ss:$12 sps:$4 sm:$0xff]   ;;  %v3568_v26 = vld [vmem:[%s5044_s1 + $0x288] ss:$12 sps:$4 sm:$0xff]  }
  0x44   :  { %1333 = vmatprep.subr.bf16.mxu0 %v3526_v28  ;;  %1742 = vmatprep.mubr.bf16.mxu1 %v4029_v30  ;;  %v3597_v28 = vld [vmem:[%s5044_s1 + $0x338] ss:$12 sps:$4 sm:$0xff]  }
  0x45   :  { %3022 = vmatprep.subr.bf16.mxu1 %v3557_v43  ;;  %v3611_v43 = vld [vmem:[%s5044_s1 + $0x440] ss:$12 sps:$4 sm:$0xff]  }
  0x46   :  { %3023 = vmatpush3.bf16.msra.mxu1 %v3558_v45  ;;  %v72_v45 = vld [vmem:[%s5043_s0 + $0x160] sm:$0xff] }
  0x47   :  { %1334 = vmatpush1.bf16.msra.mxu0 %v3524_v32  ;;  %3072 = vmatprep.subr.bf16.mxu1 %v3586_v7  ;;  %v65_v32 = vld [vmem:[%s5043_s0 + $0x128] sm:$0xff]  ;;  %v107_v7 = vld [vmem:[%s5043_s0 + $0x278] sm:$0xff] }
  0x48   :  { %1335 = vmatprep.subr.bf16.mxu0 %v3531_v33  ;;  %v73_v33 = vld [vmem:[%s5043_s0 + $0x168] sm:$0xff]  ;;  %v4258_v38 = vpack.c.bf16 %v65_v32, %v58_v31  ;;  %v40_v31 = vld [vmem:[%s5043_s0 + $0x60] sm:$0xff] }
  0x4a   :  { %1261 = vmatmul.mubr.bf16.gmra.mrb[4].mxu0 %v3898_v50  ;;  %1743 = vmatmul.mubr.bf16.gmra.mrb[20].mxu1 %v4065_v41  ;;  %v127_v50 = vld [vmem:[%s5043_s0 + $0x318] sm:$0xff] }
  0x4b   :  { %1336 = vmatpush1.bf16.msra.mxu0 %v3529_v40  ;;  %1270 = vmatprep.mubr.bf16.mxu0 %v3906_v53  ;;  %v4103_v53 = vpack.c.bf16 %v119_v49, %v112_v48  ;;  %v4108_v55 = vpack.c.bf16 %v134_v51, %v127_v50  ;;  %v3574_v40 = vld [vmem:[%s5044_s1 + $0x2b8] ss:$12 sps:$4 sm:$0xff]   ;;  %v94_v48 = vld [vmem:[%s5043_s0 + $0x210] sm:$0xff]  ;;  %v3612_v49 = vld [vmem:[%s5044_s1 + $0x380] ss:$12 sps:$4 sm:$0xff]  }
  0x4c   :  { %1337 = vmatprep.subr.bf16.mxu0 %v3536_v42  ;;  %1750 = vmatprep.mubr.bf16.mxu1 %v4073_v44  ;;  %v3607_v42 = vld [vmem:[%s5044_s1 + $0x368] ss:$12 sps:$4 sm:$0xff]   ;;  %v3616_v50 = vld [vmem:[%s5044_s1 + $0x458] ss:$12 sps:$4 sm:$0xff]   ;;  %v3577_v51 = vld [vmem:[%s5044_s1 + $0x2d0] ss:$12 sps:$4 sm:$0xff]  }
  0x4f   :  { %1338 = vmatpush1.bf16.msra.mxu0 %v3534_v46  ;;  %v79_v46 = vld [vmem:[%s5043_s0 + $0x198] sm:$0xff] }
  0x50   :  { %1339 = vmatprep.subr.bf16.mxu0 %v3541_v47  ;;  %v87_v47 = vld [vmem:[%s5043_s0 + $0x1d8] sm:$0xff] }
  0x52   :  { %1271 = vmatmul.mubr.bf16.gmra.mrb[8].mxu0 %v3934_v62  ;;  %1751 = vmatmul.mubr.bf16.gmra.mrb[24].mxu1 %v4103_v53  ;;  %v3549_v62 = vld [vmem:[%s5044_s1 + $0x210] ss:$12 sps:$4 sm:$0xff]  }
  0x53   :  { %1340 = vmatpush1.bf16.msra.mxu0 %v3539_v52  ;;  %1280 = vmatprep.mubr.bf16.mxu0 %v3942_v1  ;;  %v4140_v1 = vpack.c.bf16 %v38_v61, %v31_v60  ;;  %v4302_v52 = vpack.c.bf16 %v79_v46, %v72_v45  ;;  %v93_v60 = vld [vmem:[%s5043_s0 + $0x208] sm:$0xff]  ;;  %v3631_v46 = vld [vmem:[%s5044_s1 + $0x3f4] ss:$12 sps:$4 sm:$0xff]  }
  0x54   :  { %1341 = vmatprep.subr.bf16.mxu0 %v3546_v54  ;;  %1758 = vmatprep.mubr.bf16.mxu1 %v4108_v55  ;;  %v4307_v54 = vpack.c.bf16 %v94_v48, %v87_v47  ;;  %v101_v61 = vld [vmem:[%s5043_s0 + $0x248] sm:$0xff]  ;;  %v46_v47 = vld [vmem:[%s5043_s0 + $0x90] sm:$0xff] }
  0x55   :  { %v53_v48 = vld [vmem:[%s5043_s0 + $0xc8] sm:$0xff] }
  0x57   :  { %1342 = vmatpush1.bf16.msra.mxu0 %v3544_v56  ;;  %v3621_v56 = vld [vmem:[%s5044_s1 + $0x470] ss:$12 sps:$4 sm:$0xff]  }
  0x58   :  { %1343 = vmatprep.subr.bf16.mxu0 %v3551_v57  ;;  %v3580_v57 = vld [vmem:[%s5044_s1 + $0x2e8] ss:$12 sps:$4 sm:$0xff]  }
  0x5a   :  { %1281 = vmatmul.mubr.bf16.gmra.mrb[12].mxu0 %v3976_v12  ;;  %1759 = vmatmul.mubr.bf16.gmra.mrb[28].mxu1 %v4135_v63  ;;  %v3562_v12 = vld [vmem:[%s5044_s1 + $0x258] ss:$12 sps:$4 sm:$0xff]  }
  0x5b   :  { %1344 = vmatpush1.bf16.msra.mxu0 %v3549_v62  ;;  %1290 = vmatprep.mubr.bf16.mxu0 %v3984_v15  ;;  %v3591_v15 = vld [vmem:[%s5044_s1 + $0x3e0] ss:$12 sps:$4 sm:$0xff]   ;;  %v3622_v62 = vld [vmem:[%s5044_s1 + $0x3b0] ss:$12 sps:$4 sm:$0xff]  }
  0x5c   :  { %1345 = vmatprep.subr.bf16.mxu0 %v3556_v0  ;;  %1799 = vmatprep.mubr.bf16.mxu1 %v4140_v1  ;;  %v3583_v0 = vld [vmem:[%s5044_s1 + $0x300] ss:$12 sps:$4 sm:$0xff]  }
  0x5f   :  { %1346 = vmatpush1.bf16.msra.mxu0 %v3554_v2  ;;  %v3590_v2 = vld [vmem:[%s5044_s1 + $0x31c] ss:$12 sps:$4 sm:$0xff]  }
  0x60   :  { %1347 = vmatprep.subr.bf16.mxu0 %v3561_v3 }
  0x62   :  { %1291 = vmatmul.mubr.bf16.gmra.mrb[16].mxu0 %v4021_v27  ;;  %1800 = vmatmul.mubr.bf16.vlgmr.msra.gmra.mrb[32].mxu1 %v4170_v10  ;;  %v4222_v27 = vpack.c.bf16 %v66_v20, %v59_v19  ;;  %v136_v19 = vld [vmem:[%s5043_s0 + $0x360] sm:$0xff] }
  0x63   :  { %1348 = vmatpush1.bf16.msra.mxu0 %v3559_v9  ;;  %1300 = vmatprep.mubr.bf16.mxu0 %v4029_v30  ;;  %v3573_v30 = vld [vmem:[%s5044_s1 + $0x2a4] ss:$12 sps:$4 sm:$0xff]   ;;  %v3603_v20 = vld [vmem:[%s5044_s1 + $0x360] ss:$12 sps:$4 sm:$0xff]  }
  0x64   :  { %1349 = vmatprep.subr.bf16.mxu0 %v3564_v11  ;;  %1807 = vmatprep.mubr.bf16.mxu1 %v4178_v13  ;;  %v122_v9 = vld [vmem:[%s5043_s0 + $0x2f0] sm:$0xff]  ;;  %v4375_v11 = vpack.c.bf16 %v107_v7, %v100_v6 }
  0x65   :  { %3073 = vmatpush3.bf16.msra.mxu1 %v3587_v14  ;;  %v3598_v14 = vld [vmem:[%s5044_s1 + $0x348] ss:$12 sps:$4 sm:$0xff]  }
  0x66   :  { %3074 = vmatprep.subr.bf16.mxu1 %v3591_v15  ;;  %v3605_v15 = vld [vmem:[%s5044_s1 + $0x364] ss:$12 sps:$4 sm:$0xff]  }
  0x67   :  { %1350 = vmatpush1.bf16.msra.mxu0 %v3562_v12  ;;  %v3600_v12 = vld [vmem:[%s5044_s1 + $0x34c] ss:$12 sps:$4 sm:$0xff]  }
  0x68   :  { %1351 = vmatprep.subr.bf16.mxu0 %v3567_v16  ;;  %v114_v16 = vld [vmem:[%s5043_s0 + $0x2b0] sm:$0xff] }
  0x69   :  { %3075 = vmatpush3.bf16.msra.mxu1 %v3592_v21  ;;  %v4407_v21 = vpack.c.bf16 %v121_v17, %v114_v16 }
  0x6a   :  { %1301 = vmatmul.mubr.bf16.gmra.mrb[20].mxu0 %v4065_v41  ;;  %3076 = vmatprep.subr.bf16.mxu1 %v3596_v22  ;;  %v4266_v41 = vpack.c.bf16 %v80_v34, %v73_v33  ;;  %v3610_v22 = vld [vmem:[%s5044_s1 + $0x37c] ss:$12 sps:$4 sm:$0xff]   ;;  %v3620_v33 = vld [vmem:[%s5044_s1 + $0x3ac] ss:$12 sps:$4 sm:$0xff]  }
  0x6b   :  { %1808 = vmatmul.mubr.bf16.gmra.mrb[36].mxu1 %v4214_v24  ;;  %1352 = vmatpush1.bf16.msra.mxu0 %v3565_v23  ;;  %v4412_v23 = vpack.c.bf16 %v136_v19, %v129_v18  ;;  %v3618_v34 = vld [vmem:[%s5044_s1 + $0x3a8] ss:$12 sps:$4 sm:$0xff]  }
  0x6c   :  { %1353 = vmatprep.subr.bf16.mxu0 %v3570_v25  ;;  %1310 = vmatprep.mubr.bf16.mxu0 %v4073_v44  ;;  %v3579_v44 = vld [vmem:[%s5044_s1 + $0x2d4] ss:$12 sps:$4 sm:$0xff]   ;;  %v3608_v25 = vld [vmem:[%s5044_s1 + $0x378] ss:$12 sps:$4 sm:$0xff]  }
  0x6d   :  { %1815 = vmatprep.mubr.bf16.mxu1 %v4222_v27  ;;  %3077 = vmatpush3.bf16.msra.mxu1 %v3597_v28  ;;  %v135_v28 = vld [vmem:[%s5043_s0 + $0x358] sm:$0xff] }
  0x6e   :  { %3078 = vmatprep.subr.bf16.mxu1 %v3601_v29  ;;  %v3613_v29 = vld [vmem:[%s5044_s1 + $0x390] ss:$12 sps:$4 sm:$0xff]  }
  0x6f   :  { %1354 = vmatpush1.bf16.msra.mxu0 %v3568_v26  ;;  %v3615_v26 = vld [vmem:[%s5044_s1 + $0x394] ss:$12 sps:$4 sm:$0xff]  }
  0x70   :  { %1355 = vmatprep.subr.bf16.mxu0 %v3573_v30  ;;  %v33_v30 = vld [vmem:[%s5043_s0 + $0x28] sm:$0xff] }
  0x71   :  { %3079 = vmatpush3.bf16.msra.mxu1 %v3602_v35  ;;  %v4450_v35 = vpack.c.bf16 %v40_v31, %v33_v30 }
  0x72   :  { %1311 = vmatmul.mubr.bf16.gmra.mrb[24].mxu0 %v4103_v53  ;;  %3080 = vmatprep.subr.bf16.mxu1 %v3606_v36  ;;  %v3582_v53 = vld [vmem:[%s5044_s1 + $0x2ec] ss:$12 sps:$4 sm:$0xff]   ;;  %v3625_v36 = vld [vmem:[%s5044_s1 + $0x3c4] ss:$12 sps:$4 sm:$0xff]  }
  0x73   :  { %1816 = vmatmul.mubr.bf16.gmra.mrb[40].mxu1 %v4258_v38  ;;  %1356 = vmatpush1.bf16.msra.mxu0 %v3571_v37  ;;  %v32_v37 = vld [vmem:[%s5043_s0 + $0x20] sm:$0xff] }
  0x74   :  { %1357 = vmatprep.subr.bf16.mxu0 %v3576_v39  ;;  %1320 = vmatprep.mubr.bf16.mxu0 %v4108_v55  ;;  %v3617_v55 = vld [vmem:[%s5044_s1 + $0x398] ss:$12 sps:$4 sm:$0xff]  }
  0x75   :  { %1823 = vmatprep.mubr.bf16.mxu1 %v4266_v41  ;;  %3081 = vmatpush3.bf16.msra.mxu1 %v3607_v42  ;;  %v47_v39 = vld [vmem:[%s5043_s0 + $0x98] sm:$0xff] }
  0x76   :  { %3082 = vmatprep.subr.bf16.mxu1 %v3611_v43  ;;  %v3628_v42 = vld [vmem:[%s5044_s1 + $0x3dc] ss:$12 sps:$4 sm:$0xff]  }
  0x77   :  { %1358 = vmatpush1.bf16.msra.mxu0 %v3574_v40  ;;  %v54_v40 = vld [vmem:[%s5043_s0 + $0xd0] sm:$0xff] }
  0x78   :  { %1359 = vmatprep.subr.bf16.mxu0 %v3579_v44  ;;  %v3626_v44 = vld [vmem:[%s5044_s1 + $0x3d8] ss:$12 sps:$4 sm:$0xff]   ;;  %v4482_v45 = vpack.c.bf16 %v54_v40, %v47_v39 }
  0x79   :  { %3083 = vmatpush3.bf16.msra.mxu1 %v3612_v49  ;;  %v61_v49 = vld [vmem:[%s5043_s0 + $0x108] sm:$0xff] }
  0x7a   :  { %1321 = vmatmul.mubr.bf16.gmra.mrb[28].mxu0 %v4135_v63  ;;  %3084 = vmatprep.subr.bf16.mxu1 %v3616_v50  ;;  %v108_v63 = vld [vmem:[%s5043_s0 + $0x280] sm:$0xff] }
  0x7b   :  { %1824 = vmatmul.mubr.bf16.gmra.mrb[44].mxu1 %v4302_v52  ;;  %1360 = vmatpush1.bf16.msra.mxu0 %v3577_v51  ;;  %v4348_v3 = vpack.c.bf16 %v108_v63, %v101_v61  ;;  %v68_v50 = vld [vmem:[%s5043_s0 + $0x140] sm:$0xff]  ;;  %v3629_v51 = vld [vmem:[%s5044_s1 + $0x3f0] ss:$12 sps:$4 sm:$0xff]  }
  0x7c   :  { %1361 = vmatprep.subr.bf16.mxu0 %v3582_v53  ;;  %1363 = vmatprep.mubr.bf16.mxu0 %v4140_v1  ;;  %v4343_v1 = vpack.c.bf16 %v93_v60, %v86_v59  ;;  %v4509_v53 = vpack.c.bf16 %v53_v48, %v46_v47 }
  0x7d   :  { %1831 = vmatprep.mubr.bf16.mxu1 %v4307_v54  ;;  %3085 = vmatpush3.bf16.msra.mxu1 %v3617_v55  ;;  %v4514_v55 = vpack.c.bf16 %v68_v50, %v61_v49 }
  0x7e   :  { %3086 = vmatprep.subr.bf16.mxu1 %v3621_v56  ;;  %v3637_v56 = vld [vmem:[%s5044_s1 + $0x424] ss:$12 sps:$4 sm:$0xff]  }
  0x7f   :  { %1362 = vmatpush1.bf16.msra.mxu0 %v3580_v57  ;;  %v60_v57 = vld [vmem:[%s5043_s0 + $0x100] sm:$0xff] }
  0x80   :  { %1444 = vmatprep.subr.bf16.mxu0 %v3585_v58  ;;  %v67_v58 = vld [vmem:[%s5043_s0 + $0x138] sm:$0xff] }
  0x81   :  { %3087 = vmatpush3.bf16.msra.mxu1 %v3622_v62 }
  0x82   :  { %1364 = vmatmul.mubr.bf16.vlgmr.msra.gmra.mrb[0].mxu0 %v4170_v10  ;;  %v3593_v10 = vld [vmem:[%s5044_s1 + $0x330] ss:$12 sps:$4 sm:$0xff]  }
  0x83   :  { %1832 = vmatmul.mubr.bf16.gmra.mrb[48].mxu1 %v4343_v1  ;;  %1445 = vmatpush1.bf16.msra.mxu0 %v3583_v0 }
  0x84   :  { %1446 = vmatprep.subr.bf16.mxu0 %v3590_v2  ;;  %1373 = vmatprep.mubr.bf16.mxu0 %v4178_v13  ;;  %v4380_v13 = vpack.c.bf16 %v122_v9, %v115_v8 }
  0x85   :  { %1839 = vmatprep.mubr.bf16.mxu1 %v4348_v3 }
  0x87   :  { %1447 = vmatpush1.bf16.msra.mxu0 %v3588_v4 }
  0x88   :  { %1448 = vmatprep.subr.bf16.mxu0 %v3595_v5 }
  0x8a   :  { %1374 = vmatmul.mubr.bf16.gmra.mrb[4].mxu0 %v4214_v24  ;;  %v3650_v24 = vld [vmem:[%s5044_s1 + $0x488] ss:$12 sps:$4 sm:$0xff]  }
  0x8b   :  { %1840 = vmatmul.mubr.bf16.gmra.mrb[52].mxu1 %v4375_v11  ;;  %1449 = vmatpush1.bf16.msra.mxu0 %v3593_v10 }
  0x8c   :  { %1450 = vmatprep.subr.bf16.mxu0 %v3600_v12  ;;  %1383 = vmatprep.mubr.bf16.mxu0 %v4222_v27  ;;  %v128_v27 = vld [vmem:[%s5043_s0 + $0x320] sm:$0xff] }
  0x8d   :  { %1847 = vmatprep.mubr.bf16.mxu1 %v4380_v13  ;;  %3241 = vmatprep.subr.bf16.mxu1 %v3650_v24  ;;  %v4442_v32 = vpack.c.bf16 %v135_v28, %v128_v27 }
  0x8f   :  { %1451 = vmatpush1.bf16.msra.mxu0 %v3598_v14 }
  0x90   :  { %1452 = vmatprep.subr.bf16.mxu0 %v3605_v15 }
  0x92   :  { %1384 = vmatmul.mubr.bf16.gmra.mrb[8].mxu0 %v4258_v38  ;;  %v39_v38 = vld [vmem:[%s5043_s0 + $0x58] sm:$0xff] }
  0x93   :  { %1848 = vmatmul.mubr.bf16.gmra.mrb[56].mxu1 %v4407_v21  ;;  %1453 = vmatpush1.bf16.msra.mxu0 %v3603_v20  ;;  %v4477_v43 = vpack.c.bf16 %v39_v38, %v32_v37 }
  0x94   :  { %1454 = vmatprep.subr.bf16.mxu0 %v3610_v22  ;;  %1393 = vmatprep.mubr.bf16.mxu0 %v4266_v41  ;;  %v3623_v41 = vld [vmem:[%s5044_s1 + $0x3c0] ss:$12 sps:$4 sm:$0xff]  }
  0x95   :  { %1855 = vmatprep.mubr.bf16.mxu1 %v4412_v23 }
  0x97   :  { %1455 = vmatpush1.bf16.msra.mxu0 %v3608_v25 }
  0x98   :  { %1456 = vmatprep.subr.bf16.mxu0 %v3615_v26 }
  0x9a   :  { %1394 = vmatmul.mubr.bf16.gmra.mrb[12].mxu0 %v4302_v52  ;;  %v3634_v52 = vld [vmem:[%s5044_s1 + $0x40c] ss:$12 sps:$4 sm:$0xff]  }
  0x9b   :  { %1856 = vmatmul.mubr.bf16.gmra.mrb[60].mxu1 %v4442_v32  ;;  %1457 = vmatpush1.bf16.msra.mxu0 %v3613_v29 }
  0x9c   :  { %1458 = vmatprep.subr.bf16.mxu0 %v3620_v33  ;;  %1403 = vmatprep.mubr.bf16.mxu0 %v4307_v54  ;;  %v3632_v54 = vld [vmem:[%s5044_s1 + $0x408] ss:$12 sps:$4 sm:$0xff]  }
  0x9d   :  { %1896 = vmatprep.mubr.bf16.mxu1 %v4450_v35 }
  0x9f   :  { %1459 = vmatpush1.bf16.msra.mxu0 %v3618_v34 }
  0xa0   :  { %1460 = vmatprep.subr.bf16.mxu0 %v3625_v36 }
  0xa2   :  { %1404 = vmatmul.mubr.bf16.gmra.mrb[16].mxu0 %v4343_v1 }
  0xa3   :  { %1897 = vmatmul.mubr.bf16.vlgmr.msra.gmra.mrb[64].mxu1 %v4477_v43  ;;  %1461 = vmatpush1.bf16.msra.mxu0 %v3623_v41 }
  0xa4   :  { %1462 = vmatprep.subr.bf16.mxu0 %v3628_v42  ;;  %1413 = vmatprep.mubr.bf16.mxu0 %v4348_v3 }
  0xa5   :  { %1904 = vmatprep.mubr.bf16.mxu1 %v4482_v45  ;;  %3242 = vmatpush3.bf16.msra.mxu1 %v3650_v24 }
  0xa7   :  { %1463 = vmatpush1.bf16.msra.mxu0 %v3626_v44 }
  0xa8   :  { %1464 = vmatprep.subr.bf16.mxu0 %v3631_v46 }
  0xaa   :  { %1414 = vmatmul.mubr.bf16.gmra.mrb[20].mxu0 %v4375_v11 }
  0xab   :  { %1905 = vmatmul.mubr.bf16.gmra.mrb[68].mxu1 %v4509_v53  ;;  %1465 = vmatpush1.bf16.msra.mxu0 %v3629_v51 }
  0xac   :  { %1466 = vmatprep.subr.bf16.mxu0 %v3634_v52  ;;  %1423 = vmatprep.mubr.bf16.mxu0 %v4380_v13 }
  0xad   :  { %12 = vsyncpa [#allocation3], 0  ;;  %1912 = vmatprep.mubr.bf16.mxu1 %v4514_v55  ;;  %v75_v59 = vld [vmem:[%s5043_s0 + $0x178] sm:$0xff]  ;;  %v82_v60 = vld [vmem:[%s5043_s0 + $0x1b0] sm:$0xff]  ;;  %v158_v62 = vpack.c.bf16 %v67_v58, %v60_v57  ;;  %vm1193_vm0 = vcmask 130048  }
  0xae   :  { %v3635_v61 = vld [vmem:[%s5044_s1 + $0x420] ss:$12 sps:$4 sm:$0xff]   ;;  %v3640_v63 = vld [vmem:[%s5044_s1 + $0x43c] ss:$12 sps:$4 sm:$0xff]   ;;  %v166_v0 = vpack.c.bf16 %v82_v60, %v75_v59  ;;  %v3638_v1 = vld [vmem:[%s5044_s1 + $0x438] ss:$12 sps:$4 sm:$0xff]  }
  0xaf   :  { %1467 = vmatpush1.bf16.msra.mxu0 %v3632_v54  ;;  %v3643_v2 = vld [vmem:[%s5044_s1 + $0x454] ss:$12 sps:$4 sm:$0xff]   ;;  %v81_v4 = vld [vmem:[%s5043_s0 + $0x1a8] sm:$0xff]  ;;  %v3641_v7 = vld [vmem:[%s5044_s1 + $0x450] ss:$12 sps:$4 sm:$0xff]  }
  0xb0   :  { %1468 = vmatprep.subr.bf16.mxu0 %v3637_v56  ;;  %v74_v3 = vld [vmem:[%s5043_s0 + $0x170] sm:$0xff]  ;;  %v89_v5 = vld [vmem:[%s5043_s0 + $0x1e8] sm:$0xff]  ;;  %v96_v6 = vld [vmem:[%s5043_s0 + $0x220] sm:$0xff] }
  0xb1   :  { %v165_v8 = vpack.c.bf16 %v81_v4, %v74_v3  ;;  %v3646_v9 = vld [vmem:[%s5044_s1 + $0x46c] ss:$12 sps:$4 sm:$0xff]   ;;  %v173_v10 = vpack.c.bf16 %v96_v6, %v89_v5  ;;  %v3644_v11 = vld [vmem:[%s5044_s1 + $0x468] ss:$12 sps:$4 sm:$0xff]   ;;  %v3649_v12 = vld [vmem:[%s5044_s1 + $0x484] ss:$12 sps:$4 sm:$0xff]  }
  0xb2   :  { %1424 = vmatmul.mubr.bf16.gmra.mrb[24].mxu0 %v4407_v21  ;;  %v88_v13 = vld [vmem:[%s5043_s0 + $0x1e0] sm:$0xff]  ;;  %v95_v14 = vld [vmem:[%s5043_s0 + $0x218] sm:$0xff]  ;;  %v110_v16 = vld [vmem:[%s5043_s0 + $0x290] sm:$0xff] }
  0xb3   :  { %1913 = vmatmul.mubr.bf16.gmra.mrb[72].mxu1 %v158_v62  ;;  %1469 = vmatpush1.bf16.msra.mxu0 %v3635_v61  ;;  %v103_v15 = vld [vmem:[%s5043_s0 + $0x258] sm:$0xff]  ;;  %v3647_v17 = vld [vmem:[%s5044_s1 + $0x480] ss:$12 sps:$4 sm:$0xff]   ;;  %v172_v18 = vpack.c.bf16 %v95_v14, %v88_v13  ;;  %v102_v20 = vld [vmem:[%s5043_s0 + $0x250] sm:$0xff] }
  0xb4   :  { %1470 = vmatprep.subr.bf16.mxu0 %v3640_v63  ;;  %1433 = vmatprep.mubr.bf16.mxu0 %v4412_v23  ;;  %v180_v19 = vpack.c.bf16 %v110_v16, %v103_v15  ;;  %v109_v21 = vld [vmem:[%s5043_s0 + $0x288] sm:$0xff]  ;;  %v124_v23 = vld [vmem:[%s5043_s0 + $0x300] sm:$0xff]  ;;  %v123_v27 = vld [vmem:[%s5043_s0 + $0x2f8] sm:$0xff] }
  0xb5   :  { %1920 = vmatprep.mubr.bf16.mxu1 %v166_v0  ;;  %v117_v22 = vld [vmem:[%s5043_s0 + $0x2c8] sm:$0xff]  ;;  %v179_v24 = vpack.c.bf16 %v109_v21, %v102_v20  ;;  %v116_v26 = vld [vmem:[%s5043_s0 + $0x2c0] sm:$0xff]  ;;  %v131_v28 = vld [vmem:[%s5043_s0 + $0x338] sm:$0xff] }
  0xb6   :  { %v187_v25 = vpack.c.bf16 %v124_v23, %v117_v22  ;;  %v138_v29 = vld [vmem:[%s5043_s0 + $0x370] sm:$0xff]  ;;  %v186_v30 = vpack.c.bf16 %v123_v27, %v116_v26  ;;  %v137_v33 = vld [vmem:[%s5043_s0 + $0x368] sm:$0xff]  ;;  %v48_v38 = vld [vmem:[%s5043_s0 + $0xa0] sm:$0xff] }
  0xb7   :  { %1471 = vmatpush1.bf16.msra.mxu0 %v3638_v1  ;;  %v194_v31 = vpack.c.bf16 %v138_v29, %v131_v28  ;;  %v34_v34 = vld [vmem:[%s5043_s0 + $0x30] sm:$0xff]  ;;  %v55_v39 = vld [vmem:[%s5043_s0 + $0xd8] sm:$0xff]  ;;  %v69_v41 = vld [vmem:[%s5043_s0 + $0x148] sm:$0xff]  ;;  %v3707_v1 = vmov 0  }
  0xb8   :  { %1472 = vmatprep.subr.bf16.mxu0 %v3643_v2  ;;  %v62_v40 = vld [vmem:[%s5043_s0 + $0x110] sm:$0xff]  ;;  %v153_v42 = vpack.c.bf16 %v55_v39, %v48_v38  ;;  %v76_v44 = vld [vmem:[%s5043_s0 + $0x180] sm:$0xff]  ;;  %v97_v47 = vld [vmem:[%s5043_s0 + $0x228] sm:$0xff] }
  0xb9   :  { %v90_v46 = vld [vmem:[%s5043_s0 + $0x1f0] sm:$0xff]  ;;  %v104_v50 = vld [vmem:[%s5043_s0 + $0x260] sm:$0xff]  ;;  %v111_v51 = vld [vmem:[%s5043_s0 + $0x298] sm:$0xff] }
  0xba   :  { %1434 = vmatmul.mubr.bf16.gmra.mrb[28].mxu0 %v4442_v32  ;;  %v130_v32 = vld [vmem:[%s5043_s0 + $0x330] sm:$0xff]  ;;  %v4657_v49 = vpack.c.bf16 %v97_v47, %v90_v46  ;;  %v4674_v54 = vpack.c.bf16 %v111_v51, %v104_v50  ;;  %v132_v56 = vld [vmem:[%s5043_s0 + $0x340] sm:$0xff]  ;;  %v139_v57 = vld [vmem:[%s5043_s0 + $0x378] sm:$0xff] }
  0xbb   :  { %1921 = vmatmul.mubr.bf16.gmra.mrb[76].mxu1 %v165_v8  ;;  %1473 = vmatpush1.bf16.msra.mxu0 %v3641_v7  ;;  %v193_v36 = vpack.c.bf16 %v137_v33, %v130_v32  ;;  %v118_v52 = vld [vmem:[%s5043_s0 + $0x2d0] sm:$0xff]  ;;  %v4688_v59 = vpack.c.bf16 %v139_v57, %v132_v56  ;;  %v3651_v28 = vld [vmem:[%s5046_s3 + $0x80] sm:$0xff]   ;;  %v3652_v33 = vld [vmem:[%s5046_s3 + $0x88] sm:$0xff]  }
  0xbc   :  { %1474 = vmatprep.subr.bf16.mxu0 %v3646_v9  ;;  %1476 = vmatprep.mubr.bf16.mxu0 %v4450_v35  ;;  %v41_v35 = vld [vmem:[%s5043_s0 + $0x68] sm:$0xff]  ;;  %v4753_v46 = vld [vmem:[%s5045_s2] sm:$0x7] }
  0xbd   :  { %1928 = vmatprep.mubr.bf16.mxu1 %v173_v10  ;;  %v146_v37 = vpack.c.bf16 %v41_v35, %v34_v34  ;;  %v394_v34 = vlaneseq }
  0xbf   :  { %1475 = vmatpush1.bf16.msra.mxu0 %v3644_v11 }
  0xc0   :  { %1557 = vmatprep.subr.bf16.mxu0 %v3649_v12 }
  0xc2   :  { %1477 = vmatmul.mubr.bf16.vlgmr.msra.gmra.mrb[0].mxu0 %v4477_v43  ;;  %v160_v43 = vpack.c.bf16 %v69_v41, %v62_v40  ;;  %v4739_v41 = vshrl.u32 %v394_v34, 7 }
  0xc3   :  { %1929 = vmatmul.mubr.bf16.gmra.mrb[80].mxu1 %v172_v18  ;;  %1558 = vmatpush1.bf16.msra.mxu0 %v3647_v17 }
  0xc4   :  { %1486 = vmatprep.mubr.bf16.mxu0 %v4482_v45  ;;  %1936 = vmatprep.mubr.bf16.mxu1 %v180_v19  ;;  %v83_v45 = vld [vmem:[%s5043_s0 + $0x1b8] sm:$0xff] }
  0xc5   :  { %v167_v48 = vpack.c.bf16 %v83_v45, %v76_v44  ;;  %3259 = vmatprep.subr.bf16.mxu0 %v3651_v28  ;;  %v404_v44 = vsub.s32 2, %v4739_v41 }
  0xca   :  { %1487 = vmatmul.mubr.bf16.gmra.mrb[4].mxu0 %v4509_v53  ;;  %v125_v53 = vld [vmem:[%s5043_s0 + $0x308] sm:$0xff] }
  0xcb   :  { %1937 = vmatmul.mubr.bf16.gmra.mrb[84].mxu1 %v179_v24  ;;  %1496 = vmatprep.mubr.bf16.mxu0 %v4514_v55  ;;  %v4676_v55 = vpack.c.bf16 %v125_v53, %v118_v52  ;;  %v4761_v52 = vrot.slane %v4753_v46, %v404_v44 }
  0xcc   :  { %1944 = vmatprep.mubr.bf16.mxu1 %v187_v25 }
  0xd2   :  { %1497 = vmatmul.mubr.bf16.gmra.mrb[8].mxu0 %v158_v62 }
  0xd3   :  { %1945 = vmatmul.mubr.bf16.gmra.mrb[88].mxu1 %v186_v30  ;;  %1506 = vmatprep.mubr.bf16.mxu0 %v166_v0 }
  0xd4   :  { %1952 = vmatprep.mubr.bf16.mxu1 %v194_v31 }
  0xda   :  { %1507 = vmatmul.mubr.bf16.gmra.mrb[12].mxu0 %v165_v8 }
  0xdb   :  { %1953 = vmatmul.mubr.bf16.gmra.mrb[92].mxu1 %v193_v36  ;;  %1516 = vmatprep.mubr.bf16.mxu0 %v173_v10 }
  0xdc   :  { %3243 = vmatprep.mubr.msk.bf16.mxu1 %vm1193_vm0, %v146_v37 }
  0xe2   :  { %1517 = vmatmul.mubr.bf16.gmra.mrb[16].mxu0 %v172_v18 }
  0xe3   :  { %3244 = vmatmul.mubr.msk.bf16.vlgmr.msra.gmra.mrb[96].mxu1 %vm1193_vm0, %v153_v42  ;;  %1526 = vmatprep.mubr.bf16.mxu0 %v180_v19 }
  0xe4   :  { %3247 = vmatprep.mubr.msk.bf16.mxu1 %vm1193_vm0, %v160_v43 }
  0xea   :  { %1527 = vmatmul.mubr.bf16.gmra.mrb[20].mxu0 %v179_v24 }
  0xeb   :  { %3248 = vmatmul.mubr.msk.bf16.gmra.mrb[100].mxu1 %vm1193_vm0, %v167_v48  ;;  %1536 = vmatprep.mubr.bf16.mxu0 %v187_v25 }
  0xec   :  { %3251 = vmatprep.mubr.msk.bf16.mxu1 %vm1193_vm0, %v4657_v49 }
  0xf2   :  { %1537 = vmatmul.mubr.bf16.gmra.mrb[24].mxu0 %v186_v30 }
  0xf3   :  { %3252 = vmatmul.mubr.msk.bf16.gmra.mrb[104].mxu1 %vm1193_vm0, %v4674_v54  ;;  %1546 = vmatprep.mubr.bf16.mxu0 %v194_v31 }
  0xf4   :  { %3255 = vmatprep.mubr.msk.bf16.mxu1 %vm1193_vm0, %v4676_v55 }
  0xf5   :  { %v2960_v58 = vpop.f32.mrb[0].mxu1 }
  0xf6   :  { %v2961_v60 = vpop.f32.mrb[1].mxu1 }
  0xf7   :  { %v4690_v61 = vadd.f32 %v2961_v60, %v2960_v58  ;;  %v2963_v62 = vpop.f32.mrb[2].mxu1 }
  0xf8   :  { %v2964_v63 = vpop.f32.mrb[3].mxu1 }
  0xf9   :  { %v4692_v0 = vadd.f32 %v2964_v63, %v2963_v62  ;;  %v1705_v56 = vadd.f32 %v4690_v61, %v4761_v52 }
  0xfa   :  { %1547 = vmatmul.mubr.bf16.gmra.mrb[28].mxu0 %v193_v36 }
  0xfb   :  { %3256 = vmatmul.mubr.msk.bf16.gmra.mrb[108].mxu1 %vm1193_vm0, %v4688_v59  ;;  %1589 = vmatprep.mubr.bf16.mxu0 %v3707_v1  ;;  %v1708_v60 = vadd.f32 %v4692_v0, %v4761_v52 }
  0xfd   :  { %v2966_v2 = vpop.f32.mrb[4].mxu1 }
  0xfe   :  { %v2967_v3 = vpop.f32.mrb[5].mxu1 }
  0xff   :  { %v4697_v4 = vadd.f32 %v2967_v3, %v2966_v2  ;;  %v2969_v5 = vpop.f32.mrb[6].mxu1  ;;  %v3658_v3 = vld [vmem:[%s5046_s3 + $0xb8] sm:$0xff]  }
 0x100   :  { %v2970_v6 = vpop.f32.mrb[7].mxu1 }
 0x101   :  { %v4700_v7 = vadd.f32 %v2970_v6, %v2969_v5  ;;  %v1713_v0 = vadd.f32 %v4697_v4, %v4761_v52 }
 0x102   :  { %2894 = vmatmul.mubr.msk.bf16.vlgmr.msra.gmra.mrb[0].mxu0 %vm1193_vm0, %v146_v37  ;;  %v3653_v37 = vld [vmem:[%s5046_s3 + $0x90] sm:$0xff]  }
 0x103   :  { %1599 = vmatprep.mubr.bf16.mxu0 %v3707_v1  ;;  %3260 = vmatpush3.bf16.msra.mxu0 %v3651_v28 }
 0x104   :  { %3261 = vmatprep.subr.bf16.mxu0 %v3652_v33 }
 0x105   :  { %v2972_v8 = vpop.f32.mrb[8].mxu1 }
 0x106   :  { %v2973_v9 = vpop.f32.mrb[9].mxu1 }
 0x107   :  { %v4703_v10 = vadd.f32 %v2973_v9, %v2972_v8  ;;  %v2975_v11 = vpop.f32.mrb[10].mxu1  ;;  %3262 = vmatpush3.bf16.msra.mxu0 %v3652_v33  ;;  %v3659_v9 = vld [vmem:[%s5046_s3 + $0x40] sm:$0xff]  }
 0x108   :  { %v2976_v12 = vpop.f32.mrb[11].mxu1  ;;  %3263 = vmatprep.subr.bf16.mxu0 %v3653_v37  ;;  %3145 = vmatprep.subr.bf16.mxu1 %v3659_v9 }
 0x109   :  { %v4706_v13 = vadd.f32 %v2976_v12, %v2975_v11 }
 0x10a   :  { %2895 = vmatmul.mubr.msk.bf16.gmra.mrb[4].mxu0 %vm1193_vm0, %v153_v42 }
 0x10b   :  { %1609 = vmatprep.mubr.bf16.mxu0 %v3707_v1  ;;  %3264 = vmatpush3.bf16.msra.mxu0 %v3653_v37 }
 0x10d   :  { %v2978_v14 = vpop.f32.mrb[12].mxu1 }
 0x10e   :  { %v2979_v15 = vpop.f32.mrb[13].mxu1 }
 0x10f   :  { %v4709_v16 = vadd.f32 %v2979_v15, %v2978_v14  ;;  %v2981_v17 = vpop.f32.mrb[14].mxu1  ;;  %v3660_v14 = vld [vmem:[%s5046_s3] sm:$0xff]  }
 0x110   :  { %v2982_v18 = vpop.f32.mrb[15].mxu1  ;;  %3146 = vmatpush3.bf16.msra.mxu1 %v3660_v14 }
 0x111   :  { %v4712_v19 = vadd.f32 %v2982_v18, %v2981_v17  ;;  %v3661_v18 = vld [vmem:[%s5046_s3 + $0x48] sm:$0xff]   ;;  %v1729_v37 = vadd.f32 %v4709_v16, %v4761_v52 }
 0x112   :  { %2896 = vmatmul.mubr.msk.bf16.gmra.mrb[8].mxu0 %vm1193_vm0, %v160_v43  ;;  %v3654_v43 = vld [vmem:[%s5046_s3 + $0x98] sm:$0xff]   ;;  %3147 = vmatprep.subr.bf16.mxu1 %v3661_v18 }
 0x113   :  { %1619 = vmatprep.mubr.bf16.mxu0 %v3707_v1  ;;  %3265 = vmatprep.subr.bf16.mxu0 %v3654_v43  ;;  %v1732_v44 = vadd.f32 %v4712_v19, %v4761_v52  ;;  %v3670_v19 = vld [vmem:[%s5046_s3 + $0x28] sm:$0xff]  }
 0x114   :  { %3266 = vmatpush3.bf16.msra.mxu0 %v3654_v43  ;;  %v3667_v43 = vld [vmem:[%s5046_s3 + $0x60] sm:$0xff]  }
 0x115   :  { %v2984_v20 = vpop.f32.mrb[16].mxu1 }
 0x116   :  { %v2985_v21 = vpop.f32.mrb[17].mxu1 }
 0x117   :  { %v4715_v22 = vadd.f32 %v2985_v21, %v2984_v20  ;;  %v2987_v23 = vpop.f32.mrb[18].mxu1  ;;  %v1721_v21 = vadd.f32 %v4703_v10, %v4761_v52 }
 0x118   :  { %v2988_v24 = vpop.f32.mrb[19].mxu1 }
 0x119   :  { %v4718_v25 = vadd.f32 %v2988_v24, %v2987_v23 }
 0x11a   :  { %2897 = vmatmul.mubr.msk.bf16.gmra.mrb[12].mxu0 %vm1193_vm0, %v167_v48  ;;  %v3655_v48 = vld [vmem:[%s5046_s3 + $0xa0] sm:$0xff]  }
 0x11b   :  { %1629 = vmatprep.mubr.bf16.mxu0 %v3707_v1  ;;  %3267 = vmatprep.subr.bf16.mxu0 %v3655_v48 }
 0x11c   :  { %3268 = vmatpush3.bf16.msra.mxu0 %v3655_v48  ;;  %v3668_v48 = vld [vmem:[%s5046_s3 + $0x20] sm:$0xff]  }
 0x11d   :  { %v2990_v26 = vpop.f32.mrb[20].mxu1 }
 0x11e   :  { %v2991_v27 = vpop.f32.mrb[21].mxu1 }
 0x11f   :  { %v4724_v29 = vadd.f32 %v2991_v27, %v2990_v26  ;;  %v2993_v30 = vpop.f32.mrb[22].mxu1  ;;  %v3663_v26 = vld [vmem:[%s5046_s3 + $0x50] sm:$0xff]   ;;  %v1724_v27 = vadd.f32 %v4706_v13, %v4761_v52  ;;  %v3666_v13 = vld [vmem:[%s5046_s3 + $0x18] sm:$0xff]  }
 0x120   :  { %v2994_v31 = vpop.f32.mrb[23].mxu1 }
 0x121   :  { %v4728_v32 = vadd.f32 %v2994_v31, %v2993_v30  ;;  %v3664_v31 = vld [vmem:[%s5046_s3 + $0x10] sm:$0xff]   ;;  %v1745_v9 = vadd.f32 %v4724_v29, %v4761_v52 }
 0x122   :  { %2898 = vmatmul.mubr.msk.bf16.gmra.mrb[16].mxu0 %vm1193_vm0, %v4657_v49 }
 0x123   :  { %1639 = vmatprep.mubr.bf16.mxu0 %v3707_v1 }
 0x125   :  { %v2996_v35 = vpop.f32.mrb[24].mxu1 }
 0x126   :  { %v2997_v36 = vpop.f32.mrb[25].mxu1 }
 0x127   :  { %v4737_v38 = vadd.f32 %v2997_v36, %v2996_v35  ;;  %v2999_v39 = vpop.f32.mrb[26].mxu1  ;;  %v3665_v35 = vld [vmem:[%s5046_s3 + $0x58] sm:$0xff]  }
 0x128   :  { %v3000_v40 = vpop.f32.mrb[27].mxu1 }
 0x129   :  { %v4743_v42 = vadd.f32 %v3000_v40, %v2999_v39 }
 0x12a   :  { %2899 = vmatmul.mubr.msk.bf16.gmra.mrb[20].mxu0 %vm1193_vm0, %v4674_v54  ;;  %v3656_v54 = vld [vmem:[%s5046_s3 + $0xa8] sm:$0xff]  }
 0x12b   :  { %1649 = vmatprep.mubr.bf16.mxu0 %v3707_v1  ;;  %3269 = vmatprep.subr.bf16.mxu0 %v3656_v54  ;;  %v1756_v29 = vadd.f32 %v4743_v42, %v4761_v52 }
 0x12c   :  { %3270 = vmatpush3.bf16.msra.mxu0 %v3656_v54  ;;  %v3669_v54 = vld [vmem:[%s5046_s3 + $0x68] sm:$0xff]  }
 0x12d   :  { %v3002_v45 = vpop.f32.mrb[28].mxu1 }
 0x12e   :  { %v3003_v47 = vpop.f32.mrb[29].mxu1 }
 0x12f   :  { %v4758_v49 = vadd.f32 %v3003_v47, %v3002_v45  ;;  %v3005_v50 = vpop.f32.mrb[30].mxu1 }
 0x130   :  { %v3006_v51 = vpop.f32.mrb[31].mxu1 }
 0x131   :  { %v4765_v53 = vadd.f32 %v3006_v51, %v3005_v50 }
 0x132   :  { %2900 = vmatmul.mubr.msk.bf16.gmra.mrb[24].mxu0 %vm1193_vm0, %v4676_v55  ;;  %v3657_v55 = vld [vmem:[%s5046_s3 + $0xb0] sm:$0xff]  }
 0x133   :  { %1659 = vmatprep.mubr.bf16.mxu0 %v3707_v1  ;;  %3271 = vmatprep.subr.bf16.mxu0 %v3657_v55 }
 0x134   :  { %3272 = vmatpush3.bf16.msra.mxu0 %v3657_v55 }
 0x135   :  { %v3024_v57 = vpop.f32.mrb[32].mxu1  ;;  %3273 = vmatprep.subr.bf16.mxu0 %v3658_v3 }
 0x136   :  { %v3025_v58 = vpop.f32.mrb[33].mxu1 }
 0x137   :  { %v3026_v62 = vadd.f32 %v3025_v58, %v3024_v57  ;;  %v3027_v63 = vpop.f32.mrb[34].mxu1  ;;  %v1737_v57 = vadd.f32 %v4715_v22, %v4761_v52 }
 0x138   :  { %v3028_v2 = vpop.f32.mrb[35].mxu1  ;;  %3274 = vmatpush3.bf16.msra.mxu0 %v3658_v3 }
 0x139   :  { %v4778_v1 = vadd.f32 %v3026_v62, %v1705_v56  ;;  %v3029_v61 = vadd.f32 %v3028_v2, %v3027_v63  ;;  %v1740_v62 = vadd.f32 %v4718_v25, %v4761_v52  ;;  %v3674_v25 = vld [vmem:[%s5046_s3 + $0x38] sm:$0xff]  }
 0x13a   :  { %2901 = vmatmul.mubr.msk.bf16.gmra.mrb[28].mxu0 %vm1193_vm0, %v4688_v59  ;;  %v1716_v59 = vadd.f32 %v4700_v7, %v4761_v52  ;;  %v3662_v7 = vld [vmem:[%s5046_s3 + $0x8] sm:$0xff]  }
 0x13b   :  { %v4785_v5 = vadd.f32 %v3029_v61, %v1708_v60  ;;  %3148 = vmatpush3.bf16.msra.mxu1 %v3662_v7  ;;  %v3671_v60 = vld [vmem:[%s5046_s3 + $0x70] sm:$0xff]  }
 0x13c   :  { %3149 = vmatprep.subr.bf16.mxu1 %v3663_v26  ;;  %v3672_v61 = vld [vmem:[%s5046_s3 + $0x30] sm:$0xff]  }
 0x13e   :  { %v3030_v6 = vpop.f32.mrb[36].mxu1 }
 0x13f   :  { %v3031_v8 = vpop.f32.mrb[37].mxu1  ;;  %3150 = vmatpush3.bf16.msra.mxu1 %v3664_v31 }
 0x140   :  { %v3032_v11 = vadd.f32 %v3031_v8, %v3030_v6  ;;  %v3033_v12 = vpop.f32.mrb[38].mxu1  ;;  %3151 = vmatprep.subr.bf16.mxu1 %v3665_v35  ;;  %v3673_v6 = vld [vmem:[%s5046_s3 + $0x78] sm:$0xff]  }
 0x141   :  { %v3034_v15 = vpop.f32.mrb[39].mxu1 }
 0x142   :  { %v4797_v17 = vadd.f32 %v3032_v11, %v1713_v0  ;;  %v3035_v4 = vadd.f32 %v3034_v15, %v3033_v12  ;;  %v1748_v12 = vadd.f32 %v4728_v32, %v4761_v52 }
 0x143   :  { %3152 = vmatpush3.bf16.msra.mxu1 %v3666_v13 }
 0x144   :  { %v4802_v20 = vadd.f32 %v3035_v4, %v1716_v59  ;;  %3153 = vmatprep.subr.bf16.mxu1 %v3667_v43 }
 0x146   :  { %v3036_v23 = vpop.f32.mrb[40].mxu1 }
 0x147   :  { %v3037_v24 = vpop.f32.mrb[41].mxu1  ;;  %3154 = vmatpush3.bf16.msra.mxu1 %v3668_v48 }
 0x148   :  { %v3038_v28 = vadd.f32 %v3037_v24, %v3036_v23  ;;  %v3039_v30 = vpop.f32.mrb[42].mxu1  ;;  %3155 = vmatprep.subr.bf16.mxu1 %v3669_v54  ;;  %v1753_v23 = vadd.f32 %v4737_v38, %v4761_v52  ;;  %v1764_v38 = vadd.f32 %v4765_v53, %v4761_v52 }
 0x149   :  { %v3040_v33 = vpop.f32.mrb[43].mxu1 }
 0x14a   :  { %v4817_v34 = vadd.f32 %v3038_v28, %v1721_v21  ;;  %v3041_v10 = vadd.f32 %v3040_v33, %v3039_v30 }
 0x14b   :  { %3156 = vmatpush3.bf16.msra.mxu1 %v3670_v19 }
 0x14c   :  { %v4822_v36 = vadd.f32 %v3041_v10, %v1724_v27  ;;  %3157 = vmatprep.subr.bf16.mxu1 %v3671_v60  ;;  %v1761_v10 = vadd.f32 %v4758_v49, %v4761_v52 }
 0x14e   :  { %v3042_v39 = vpop.f32.mrb[44].mxu1 }
 0x14f   :  { %v3043_v40 = vpop.f32.mrb[45].mxu1  ;;  %3158 = vmatpush3.bf16.msra.mxu1 %v3672_v61 }
 0x150   :  { %v3044_v45 = vadd.f32 %v3043_v40, %v3042_v39  ;;  %v3045_v47 = vpop.f32.mrb[46].mxu1  ;;  %3159 = vmatprep.subr.bf16.mxu1 %v3673_v6 }
 0x151   :  { %v3046_v50 = vpop.f32.mrb[47].mxu1 }
 0x152   :  { %v4837_v51 = vadd.f32 %v3044_v45, %v1729_v37  ;;  %v3047_v16 = vadd.f32 %v3046_v50, %v3045_v47 }
 0x153   :  { %3160 = vmatpush3.bf16.msra.mxu1 %v3674_v25 }
 0x154   :  { %v4842_v56 = vadd.f32 %v3047_v16, %v1732_v44 }
 0x156   :  { %v3048_v58 = vpop.f32.mrb[48].mxu1 }
 0x157   :  { %v3049_v55 = vpop.f32.mrb[49].mxu1 }
 0x158   :  { %v3050_v63 = vadd.f32 %v3049_v55, %v3048_v58  ;;  %v3051_v2 = vpop.f32.mrb[50].mxu1 }
 0x159   :  { %v3052_v3 = vpop.f32.mrb[51].mxu1 }
 0x15a   :  { %v4857_v0 = vadd.f32 %v3050_v63, %v1737_v57  ;;  %v3053_v22 = vadd.f32 %v3052_v3, %v3051_v2 }
 0x15c   :  { %v4862_v8 = vadd.f32 %v3053_v22, %v1740_v62 }
 0x15e   :  { %v3054_v59 = vpop.f32.mrb[52].mxu1 }
 0x15f   :  { %v3055_v11 = vpop.f32.mrb[53].mxu1 }
 0x160   :  { %v3056_v14 = vadd.f32 %v3055_v11, %v3054_v59  ;;  %v3057_v15 = vpop.f32.mrb[54].mxu1 }
 0x161   :  { %v3058_v4 = vpop.f32.mrb[55].mxu1 }
 0x162   :  { %v4871_v18 = vadd.f32 %v3056_v14, %v1745_v9  ;;  %v3059_v7 = vadd.f32 %v3058_v4, %v3057_v15 }
 0x164   :  { %v4873_v21 = vadd.f32 %v3059_v7, %v1748_v12 }
 0x166   :  { %v3060_v24 = vpop.f32.mrb[56].mxu1 }
 0x167   :  { %v3061_v26 = vpop.f32.mrb[57].mxu1 }
 0x168   :  { %v3062_v27 = vadd.f32 %v3061_v26, %v3060_v24  ;;  %v3063_v28 = vpop.f32.mrb[58].mxu1 }
 0x169   :  { %v3064_v30 = vpop.f32.mrb[59].mxu1 }
 0x16a   :  { %v4879_v32 = vadd.f32 %v3062_v27, %v1753_v23  ;;  %v3065_v31 = vadd.f32 %v3064_v30, %v3063_v28 }
 0x16c   :  { %v4881_v33 = vadd.f32 %v3065_v31, %v1756_v29 }
 0x16e   :  { %v3066_v35 = vpop.f32.mrb[60].mxu1 }
 0x16f   :  { %v3067_v13 = vpop.f32.mrb[61].mxu1 }
 0x170   :  { %v3068_v37 = vadd.f32 %v3067_v13, %v3066_v35  ;;  %v3069_v39 = vpop.f32.mrb[62].mxu1 }
 0x171   :  { %v3070_v40 = vpop.f32.mrb[63].mxu1 }
 0x172   :  { %v4887_v42 = vadd.f32 %v3068_v37, %v1761_v10  ;;  %v3071_v43 = vadd.f32 %v3070_v40, %v3069_v39 }
 0x174   :  { %v4889_v44 = vadd.f32 %v3071_v43, %v1764_v38 }
 0x176   :  { %v3088_v45 = vpop.f32.mrb[64].mxu1 }
 0x177   :  { %v3089_v47 = vpop.f32.mrb[65].mxu1 }
 0x178   :  { %v3090_v48 = vadd.f32 %v3089_v47, %v3088_v45  ;;  %v3091_v50 = vpop.f32.mrb[66].mxu1 }
 0x179   :  { %v3092_v16 = vpop.f32.mrb[67].mxu1 }
 0x17a   :  { %v3093_v54 = vadd.f32 %v3092_v16, %v3091_v50  ;;  %v1899_v49 = vadd.f32 %v3090_v48, %v4778_v1 }
 0x17c   :  { %v4893_v19 = vadd.f32 %v3093_v54, %v4785_v5 }
 0x17e   :  { %v3094_v52 = vpop.f32.mrb[68].mxu1 }
 0x17f   :  { %v3095_v53 = vpop.f32.mrb[69].mxu1 }
 0x180   :  { %v3096_v57 = vadd.f32 %v3095_v53, %v3094_v52  ;;  %v3097_v58 = vpop.f32.mrb[70].mxu1 }
 0x181   :  { %v3098_v55 = vpop.f32.mrb[71].mxu1 }
 0x182   :  { %v3099_v60 = vadd.f32 %v3098_v55, %v3097_v58  ;;  %v1907_v62 = vadd.f32 %v3096_v57, %v4797_v17 }
 0x184   :  { %v1910_v63 = vadd.f32 %v3099_v60, %v4802_v20 }
 0x186   :  { %v3100_v2 = vpop.f32.mrb[72].mxu1 }
 0x187   :  { %v3101_v61 = vpop.f32.mrb[73].mxu1 }
 0x188   :  { %v3102_v3 = vadd.f32 %v3101_v61, %v3100_v2  ;;  %v3103_v22 = vpop.f32.mrb[74].mxu1 }
 0x189   :  { %v3104_v6 = vpop.f32.mrb[75].mxu1 }
 0x18a   :  { %v3105_v25 = vadd.f32 %v3104_v6, %v3103_v22  ;;  %v1915_v1 = vadd.f32 %v3102_v3, %v4817_v34 }
 0x18c   :  { %v4899_v5 = vadd.f32 %v3105_v25, %v4822_v36 }
 0x18e   :  { %v3106_v9 = vpop.f32.mrb[76].mxu1 }
 0x18f   :  { %v3107_v59 = vpop.f32.mrb[77].mxu1 }
 0x190   :  { %v3108_v11 = vadd.f32 %v3107_v59, %v3106_v9  ;;  %v3109_v12 = vpop.f32.mrb[78].mxu1 }
 0x191   :  { %v3110_v14 = vpop.f32.mrb[79].mxu1 }
 0x192   :  { %v3111_v15 = vadd.f32 %v3110_v14, %v3109_v12  ;;  %v1923_v17 = vadd.f32 %v3108_v11, %v4837_v51 }
 0x194   :  { %v1926_v20 = vadd.f32 %v3111_v15, %v4842_v56 }
 0x196   :  { %v3112_v4 = vpop.f32.mrb[80].mxu1 }
 0x197   :  { %v3113_v7 = vpop.f32.mrb[81].mxu1 }
 0x198   :  { %v3114_v23 = vadd.f32 %v3113_v7, %v3112_v4  ;;  %v3115_v24 = vpop.f32.mrb[82].mxu1 }
 0x199   :  { %v3116_v26 = vpop.f32.mrb[83].mxu1 }
 0x19a   :  { %v3117_v29 = vadd.f32 %v3116_v26, %v3115_v24  ;;  %v1931_v34 = vadd.f32 %v3114_v23, %v4857_v0 }
 0x19c   :  { %v4905_v36 = vadd.f32 %v3117_v29, %v4862_v8 }
 0x19e   :  { %v3118_v27 = vpop.f32.mrb[84].mxu1 }
 0x19f   :  { %v3119_v28 = vpop.f32.mrb[85].mxu1 }
 0x1a0   :  { %v3120_v30 = vadd.f32 %v3119_v28, %v3118_v27  ;;  %v3121_v31 = vpop.f32.mrb[86].mxu1 }
 0x1a1   :  { %v3122_v10 = vpop.f32.mrb[87].mxu1 }
 0x1a2   :  { %v3123_v35 = vadd.f32 %v3122_v10, %v3121_v31  ;;  %v1939_v51 = vadd.f32 %v3120_v30, %v4871_v18 }
 0x1a4   :  { %v1942_v56 = vadd.f32 %v3123_v35, %v4873_v21 }
 0x1a6   :  { %v3124_v13 = vpop.f32.mrb[88].mxu1 }
 0x1a7   :  { %v3125_v38 = vpop.f32.mrb[89].mxu1 }
 0x1a8   :  { %v3126_v37 = vadd.f32 %v3125_v38, %v3124_v13  ;;  %v3127_v39 = vpop.f32.mrb[90].mxu1  ;;  %v396_v38 = vsub.s32 0, %v4739_v41 }
 0x1a9   :  { %v3128_v40 = vpop.f32.mrb[91].mxu1 }
 0x1aa   :  { %v3129_v43 = vadd.f32 %v3128_v40, %v3127_v39  ;;  %v1947_v0 = vadd.f32 %v3126_v37, %v4879_v32 }
 0x1ac   :  { %v4911_v8 = vadd.f32 %v3129_v43, %v4881_v33 }
 0x1ae   :  { %v3130_v45 = vpop.f32.mrb[92].mxu1 }
 0x1af   :  { %v3131_v47 = vpop.f32.mrb[93].mxu1 }
 0x1b0   :  { %v3132_v48 = vadd.f32 %v3131_v47, %v3130_v45  ;;  %v3133_v50 = vpop.f32.mrb[94].mxu1  ;;  %v4922_v45 = vrot.slane %v4753_v46, %v396_v38 }
 0x1b1   :  { %v3134_v16 = vpop.f32.mrb[95].mxu1 }
 0x1b2   :  { %v3135_v54 = vadd.f32 %v3134_v16, %v3133_v50  ;;  %v1955_v18 = vadd.f32 %v3132_v48, %v4887_v42 }
 0x1b4   :  { %v1958_v21 = vadd.f32 %v3135_v54, %v4889_v44 }
 0x1b6   :  { %v3245_v52 = vpop.f32.mrb[96].mxu1 }
 0x1b7   :  { %v2004_v53 = vadd.f32 %v3245_v52, %v1907_v62  ;;  %v1995_v57 = vpop.f32.mrb[97].mxu1 }
 0x1b8   :  { %v1996_v58 = vadd.f32 %v1995_v57, %v1899_v49  ;;  %v3246_v55 = vpop.f32.mrb[98].mxu1 }
 0x1b9   :  { %v2007_v60 = vadd.f32 %v3246_v55, %v1910_v63  ;;  %v1998_v32 = vpop.f32.mrb[99].mxu1  ;;  %v2066_v2 = vmax.f32 %v2004_v53, 0.0 }
 0x1ba   :  { %v1999_v33 = vadd.f32 %v1998_v32, %v4893_v19  ;;  %v2060_v3 = vmax.f32 %v1996_v58, 0.0 }
 0x1bb   :  { %v2069_v61 = vmax.f32 %v2007_v60, 0.0 }
 0x1bc   :  { %v2063_v22 = vmax.f32 %v1999_v33, 0.0 }
 0x1bd   :  { %v2111_v6 = vpack.c.bf16 %v2069_v61, %v2066_v2 }
 0x1be   :  { %v2108_v25 = vpack.c.bf16 %v2063_v22, %v2060_v3  ;;  %v3249_v9 = vpop.f32.mrb[100].mxu1 }
 0x1bf   :  { %v2020_v59 = vadd.f32 %v3249_v9, %v1923_v17  ;;  %v2011_v42 = vpop.f32.mrb[101].mxu1 }
 0x1c0   :  { %v2012_v11 = vadd.f32 %v2011_v42, %v1915_v1  ;;  %v3250_v44 = vpop.f32.mrb[102].mxu1  ;;  %3275 = vmatprep.mubr.bf16.mxu0 %v2108_v25 }
 0x1c1   :  { %v2023_v62 = vadd.f32 %v3250_v44, %v1926_v20  ;;  %v2014_v12 = vpop.f32.mrb[103].mxu1  ;;  %3276 = vmatmul.mubr.bf16.vlgmr.msra.gmra.mrb[32].mxu0 %v2111_v6  ;;  %v2078_v63 = vmax.f32 %v2020_v59, 0.0 }
 0x1c2   :  { %v2015_v49 = vadd.f32 %v2014_v12, %v4899_v5  ;;  %v2072_v19 = vmax.f32 %v2012_v11, 0.0 }
 0x1c3   :  { %v2081_v14 = vmax.f32 %v2023_v62, 0.0 }
 0x1c4   :  { %v2075_v15 = vmax.f32 %v2015_v49, 0.0 }
 0x1c5   :  { %v2117_v4 = vpack.c.bf16 %v2081_v14, %v2078_v63 }
 0x1c6   :  { %v2114_v7 = vpack.c.bf16 %v2075_v15, %v2072_v19  ;;  %v3253_v23 = vpop.f32.mrb[104].mxu1 }
 0x1c7   :  { %v2036_v24 = vadd.f32 %v3253_v23, %v1939_v51  ;;  %v2027_v26 = vpop.f32.mrb[105].mxu1 }
 0x1c8   :  { %v2028_v29 = vadd.f32 %v2027_v26, %v1931_v34  ;;  %v3254_v17 = vpop.f32.mrb[106].mxu1  ;;  %3279 = vmatprep.mubr.bf16.mxu0 %v2114_v7  ;;  %v400_v34 = vsub.s32 1, %v4739_v41 }
 0x1c9   :  { %v2039_v1 = vadd.f32 %v3254_v17, %v1942_v56  ;;  %v2030_v27 = vpop.f32.mrb[107].mxu1  ;;  %3280 = vmatmul.mubr.bf16.gmra.mrb[36].mxu0 %v2117_v4  ;;  %v2090_v28 = vmax.f32 %v2036_v24, 0.0 }
 0x1ca   :  { %v2031_v20 = vadd.f32 %v2030_v27, %v4905_v36  ;;  %v2084_v5 = vmax.f32 %v2028_v29, 0.0  ;;  %v4925_v50 = vrot.slane %v4753_v46, %v400_v34 }
 0x1cb   :  { %v2093_v30 = vmax.f32 %v2039_v1, 0.0 }
 0x1cc   :  { %v2087_v31 = vmax.f32 %v2031_v20, 0.0 }
 0x1cd   :  { %v2123_v10 = vpack.c.bf16 %v2093_v30, %v2090_v28 }
 0x1ce   :  { %v2120_v35 = vpack.c.bf16 %v2087_v31, %v2084_v5  ;;  %v3257_v13 = vpop.f32.mrb[108].mxu1 }
 0x1cf   :  { %v2052_v37 = vadd.f32 %v3257_v13, %v1955_v18  ;;  %v2043_v51 = vpop.f32.mrb[109].mxu1 }
 0x1d0   :  { %v2044_v39 = vadd.f32 %v2043_v51, %v1947_v0  ;;  %v3258_v40 = vpop.f32.mrb[110].mxu1  ;;  %3283 = vmatprep.mubr.bf16.mxu0 %v2120_v35 }
 0x1d1   :  { %v2055_v56 = vadd.f32 %v3258_v40, %v1958_v21  ;;  %v2046_v43 = vpop.f32.mrb[111].mxu1  ;;  %3284 = vmatmul.mubr.bf16.gmra.mrb[40].mxu0 %v2123_v10  ;;  %v2102_v47 = vmax.f32 %v2052_v37, 0.0 }
 0x1d2   :  { %v2047_v36 = vadd.f32 %v2046_v43, %v4911_v8  ;;  %v2096_v16 = vmax.f32 %v2044_v39, 0.0 }
 0x1d3   :  { %v2105_v48 = vmax.f32 %v2055_v56, 0.0 }
 0x1d4   :  { %v2099_v54 = vmax.f32 %v2047_v36, 0.0 }
 0x1d5   :  { %v2129_v18 = vpack.c.bf16 %v2105_v48, %v2102_v47  ;;  %v1591_v41 = vpop.f32.mrb[0].mxu0 }
 0x1d6   :  { %v2126_v0 = vpack.c.bf16 %v2099_v54, %v2096_v16  ;;  %v3323_v52 = vadd.f32 %v1591_v41, %v4922_v45  ;;  %v1593_v21 = vpop.f32.mrb[1].mxu0 }
 0x1d7   :  { %v3324_v53 = vadd.f32 %v1593_v21, %v4925_v50  ;;  %v1595_v57 = vpop.f32.mrb[2].mxu0 }
 0x1d8   :  { %v3325_v8 = vadd.f32 %v1595_v57, %v4922_v45  ;;  %3287 = vmatprep.mubr.bf16.mxu0 %v2126_v0  ;;  %v1597_v58 = vpop.f32.mrb[3].mxu0  ;;  %v2058_v46 = vmax.f32 %v3323_v52, 0.0 }
 0x1d9   :  { %v3326_v55 = vadd.f32 %v1597_v58, %v4925_v50  ;;  %3288 = vmatmul.mubr.bf16.gmra.mrb[44].mxu0 %v2129_v18  ;;  %v2059_v32 = vmax.f32 %v3324_v53, 0.0 }
 0x1da   :  { %v2061_v60 = vmax.f32 %v3325_v8, 0.0 }
 0x1db   :  { %v2062_v33 = vmax.f32 %v3326_v55, 0.0 }
 0x1dc   :  { %v2106_v2 = vpack.c.bf16 %v2061_v60, %v2058_v46 }
 0x1dd   :  { %v2107_v61 = vpack.c.bf16 %v2062_v33, %v2059_v32  ;;  %v1601_v3 = vpop.f32.mrb[4].mxu0 }
 0x1de   :  { %v3327_v22 = vadd.f32 %v1601_v3, %v4922_v45  ;;  %v1603_v6 = vpop.f32.mrb[5].mxu0 }
 0x1df   :  { %v3328_v25 = vadd.f32 %v1603_v6, %v4925_v50  ;;  %v1605_v9 = vpop.f32.mrb[6].mxu0  ;;  %2361 = vmatprep.mubr.bf16.mxu1 %v2107_v61 }
 0x1e0   :  { %v3329_v59 = vadd.f32 %v1605_v9, %v4922_v45  ;;  %v1607_v42 = vpop.f32.mrb[7].mxu0  ;;  %2362 = vmatmul.mubr.bf16.vlgmr.msra.gmra.mrb[112].mxu1 %v2106_v2  ;;  %v2064_v44 = vmax.f32 %v3327_v22, 0.0 }
 0x1e1   :  { %v3330_v11 = vadd.f32 %v1607_v42, %v4925_v50  ;;  %v2065_v12 = vmax.f32 %v3328_v25, 0.0 }
 0x1e2   :  { %v2067_v62 = vmax.f32 %v3329_v59, 0.0 }
 0x1e3   :  { %v2068_v49 = vmax.f32 %v3330_v11, 0.0 }
 0x1e4   :  { %v2109_v63 = vpack.c.bf16 %v2067_v62, %v2064_v44 }
 0x1e5   :  { %v2110_v14 = vpack.c.bf16 %v2068_v49, %v2065_v12  ;;  %v1611_v19 = vpop.f32.mrb[8].mxu0 }
 0x1e6   :  { %v3331_v15 = vadd.f32 %v1611_v19, %v4922_v45  ;;  %v1613_v4 = vpop.f32.mrb[9].mxu0 }
 0x1e7   :  { %v3332_v7 = vadd.f32 %v1613_v4, %v4925_v50  ;;  %v1615_v23 = vpop.f32.mrb[10].mxu0  ;;  %2369 = vmatprep.mubr.bf16.mxu1 %v2110_v14 }
 0x1e8   :  { %v3333_v24 = vadd.f32 %v1615_v23, %v4922_v45  ;;  %v1617_v26 = vpop.f32.mrb[11].mxu0  ;;  %2370 = vmatmul.mubr.bf16.gmra.mrb[116].mxu1 %v2109_v63  ;;  %v2070_v17 = vmax.f32 %v3331_v15, 0.0 }
 0x1e9   :  { %v3334_v29 = vadd.f32 %v1617_v26, %v4925_v50  ;;  %v2071_v27 = vmax.f32 %v3332_v7, 0.0 }
 0x1ea   :  { %v2073_v1 = vmax.f32 %v3333_v24, 0.0 }
 0x1eb   :  { %v2074_v20 = vmax.f32 %v3334_v29, 0.0 }
 0x1ec   :  { %v2112_v28 = vpack.c.bf16 %v2073_v1, %v2070_v17 }
 0x1ed   :  { %v2113_v30 = vpack.c.bf16 %v2074_v20, %v2071_v27  ;;  %v1621_v5 = vpop.f32.mrb[12].mxu0 }
 0x1ee   :  { %v3335_v31 = vadd.f32 %v1621_v5, %v4922_v45  ;;  %v1623_v10 = vpop.f32.mrb[13].mxu0 }
 0x1ef   :  { %v3336_v35 = vadd.f32 %v1623_v10, %v4925_v50  ;;  %v1625_v13 = vpop.f32.mrb[14].mxu0  ;;  %2377 = vmatprep.mubr.bf16.mxu1 %v2113_v30 }
 0x1f0   :  { %v3337_v38 = vadd.f32 %v1625_v13, %v4922_v45  ;;  %v1627_v37 = vpop.f32.mrb[15].mxu0  ;;  %2378 = vmatmul.mubr.bf16.gmra.mrb[120].mxu1 %v2112_v28  ;;  %v2076_v34 = vmax.f32 %v3335_v31, 0.0 }
 0x1f1   :  { %v3338_v51 = vadd.f32 %v1627_v37, %v4925_v50  ;;  %v2077_v40 = vmax.f32 %v3336_v35, 0.0 }
 0x1f2   :  { %v2079_v39 = vmax.f32 %v3337_v38, 0.0 }
 0x1f3   :  { %v2080_v56 = vmax.f32 %v3338_v51, 0.0 }
 0x1f4   :  { %v2115_v43 = vpack.c.bf16 %v2079_v39, %v2076_v34  ;;  %v3675_v34 = vld [vmem:[%s5048_s5] sm:$0xff]   ;;  %v3678_v39 = vld [vmem:[%s5048_s5 + $0x18] sm:$0xff]  }
 0x1f5   :  { %v2116_v36 = vpack.c.bf16 %v2080_v56, %v2077_v40  ;;  %v1631_v47 = vpop.f32.mrb[16].mxu0  ;;  %3291 = vmatprep.subr.bf16.mxu1 %v3675_v34  ;;  %v3679_v40 = vld [vmem:[%s5048_s5 + $0x20] sm:$0xff]   ;;  %v3680_v56 = vld [vmem:[%s5048_s5 + $0x28] sm:$0xff]  }
 0x1f6   :  { %v3339_v48 = vadd.f32 %v1631_v47, %v4922_v45  ;;  %v1633_v16 = vpop.f32.mrb[17].mxu0  ;;  %3292 = vmatpush3.bf16.msra.mxu1 %v3675_v34 }
 0x1f7   :  { %v3340_v54 = vadd.f32 %v1633_v16, %v4925_v50  ;;  %v1635_v18 = vpop.f32.mrb[18].mxu0  ;;  %2385 = vmatprep.mubr.bf16.mxu1 %v2116_v36  ;;  %v3682_v36 = vld [vmem:[%s5048_s5 + $0x38] sm:$0xff]  }
 0x1f8   :  { %v3341_v41 = vadd.f32 %v1635_v18, %v4922_v45  ;;  %v1637_v0 = vpop.f32.mrb[19].mxu0  ;;  %2386 = vmatmul.mubr.bf16.gmra.mrb[124].mxu1 %v2115_v43  ;;  %v2082_v21 = vmax.f32 %v3339_v48, 0.0  ;;  %v3681_v43 = vld [vmem:[%s5048_s5 + $0x30] sm:$0xff]  }
 0x1f9   :  { %v3342_v52 = vadd.f32 %v1637_v0, %v4925_v50  ;;  %v2083_v57 = vmax.f32 %v3340_v54, 0.0 }
 0x1fa   :  { %v2085_v53 = vmax.f32 %v3341_v41, 0.0 }
 0x1fb   :  { %v2086_v8 = vmax.f32 %v3342_v52, 0.0 }
 0x1fc   :  { %v2118_v58 = vpack.c.bf16 %v2085_v53, %v2082_v21 }
 0x1fd   :  { %v2119_v55 = vpack.c.bf16 %v2086_v8, %v2083_v57  ;;  %v1641_v46 = vpop.f32.mrb[20].mxu0 }
 0x1fe   :  { %v3343_v60 = vadd.f32 %v1641_v46, %v4922_v45  ;;  %v1643_v32 = vpop.f32.mrb[21].mxu0 }
 0x1ff   :  { %v3344_v33 = vadd.f32 %v1643_v32, %v4925_v50  ;;  %v1645_v2 = vpop.f32.mrb[22].mxu0  ;;  %2393 = vmatprep.mubr.bf16.mxu1 %v2119_v55 }
 0x200   :  { %v3345_v61 = vadd.f32 %v1645_v2, %v4922_v45  ;;  %v1647_v3 = vpop.f32.mrb[23].mxu0  ;;  %2394 = vmatmul.mubr.bf16.gmra.mrb[128].mxu1 %v2118_v58  ;;  %v2088_v6 = vmax.f32 %v3343_v60, 0.0 }
 0x201   :  { %v3346_v22 = vadd.f32 %v1647_v3, %v4925_v50  ;;  %v2089_v9 = vmax.f32 %v3344_v33, 0.0  ;;  %v5002_v33 = vld [vmem:[%s5047_s4] ss:$0 sm:$0xff] }
 0x202   :  { %v2091_v25 = vmax.f32 %v3345_v61, 0.0 }
 0x203   :  { %v2092_v59 = vmax.f32 %v3346_v22, 0.0 }
 0x204   :  { %v2121_v42 = vpack.c.bf16 %v2091_v25, %v2088_v6 }
 0x205   :  { %v2122_v11 = vpack.c.bf16 %v2092_v59, %v2089_v9  ;;  %v1651_v44 = vpop.f32.mrb[24].mxu0 }
 0x206   :  { %v3347_v62 = vadd.f32 %v1651_v44, %v4922_v45  ;;  %v1653_v12 = vpop.f32.mrb[25].mxu0 }
 0x207   :  { %v3348_v49 = vadd.f32 %v1653_v12, %v4925_v50  ;;  %v1655_v63 = vpop.f32.mrb[26].mxu0  ;;  %2401 = vmatprep.mubr.bf16.mxu1 %v2122_v11 }
 0x208   :  { %v3349_v14 = vadd.f32 %v1655_v63, %v4922_v45  ;;  %v1657_v19 = vpop.f32.mrb[27].mxu0  ;;  %2402 = vmatmul.mubr.bf16.gmra.mrb[132].mxu1 %v2121_v42  ;;  %v2094_v4 = vmax.f32 %v3347_v62, 0.0 }
 0x209   :  { %v3350_v15 = vadd.f32 %v1657_v19, %v4925_v50  ;;  %v2095_v23 = vmax.f32 %v3348_v49, 0.0 }
 0x20a   :  { %v2097_v7 = vmax.f32 %v3349_v14, 0.0 }
 0x20b   :  { %v2098_v24 = vmax.f32 %v3350_v15, 0.0 }
 0x20c   :  { %v2124_v26 = vpack.c.bf16 %v2097_v7, %v2094_v4 }
 0x20d   :  { %v2125_v29 = vpack.c.bf16 %v2098_v24, %v2095_v23  ;;  %v1661_v17 = vpop.f32.mrb[28].mxu0 }
 0x20e   :  { %v3351_v1 = vadd.f32 %v1661_v17, %v4922_v45  ;;  %v1663_v27 = vpop.f32.mrb[29].mxu0 }
 0x20f   :  { %v3352_v20 = vadd.f32 %v1663_v27, %v4925_v50  ;;  %v1665_v28 = vpop.f32.mrb[30].mxu0  ;;  %2409 = vmatprep.mubr.bf16.mxu1 %v2125_v29 }
 0x210   :  { %v3353_v30 = vadd.f32 %v1665_v28, %v4922_v45  ;;  %v1667_v5 = vpop.f32.mrb[31].mxu0  ;;  %2410 = vmatmul.mubr.bf16.gmra.mrb[136].mxu1 %v2124_v26  ;;  %v2100_v10 = vmax.f32 %v3351_v1, 0.0  ;;  %v3676_v45 = vld [vmem:[%s5048_s5 + $0x8] sm:$0xff]  }
 0x211   :  { %v3354_v31 = vadd.f32 %v1667_v5, %v4925_v50  ;;  %v2101_v13 = vmax.f32 %v3352_v20, 0.0  ;;  %3293 = vmatprep.subr.bf16.mxu1 %v3676_v45  ;;  %v3677_v50 = vld [vmem:[%s5048_s5 + $0x10] sm:$0xff]  }
 0x212   :  { %v2103_v35 = vmax.f32 %v3353_v30, 0.0  ;;  %3294 = vmatpush3.bf16.msra.mxu1 %v3676_v45 }
 0x213   :  { %v2104_v38 = vmax.f32 %v3354_v31, 0.0  ;;  %3295 = vmatprep.subr.bf16.mxu1 %v3677_v50 }
 0x214   :  { %v2127_v37 = vpack.c.bf16 %v2103_v35, %v2100_v10 }
 0x215   :  { %v2128_v51 = vpack.c.bf16 %v2104_v38, %v2101_v13 }
 0x216   :  { %3296 = vmatpush3.bf16.msra.mxu1 %v3677_v50 }
 0x217   :  { %2417 = vmatprep.mubr.bf16.mxu1 %v2128_v51  ;;  %3297 = vmatprep.subr.bf16.mxu1 %v3678_v39 }
 0x218   :  { %2418 = vmatmul.mubr.bf16.gmra.mrb[140].mxu1 %v2127_v37 }
 0x21a   :  { %3298 = vmatpush3.bf16.msra.mxu1 %v3678_v39 }
 0x21b   :  { %3299 = vmatprep.subr.bf16.mxu1 %v3679_v40 }
 0x21e   :  { %3300 = vmatpush3.bf16.msra.mxu1 %v3679_v40 }
 0x21f   :  { %3301 = vmatprep.subr.bf16.mxu1 %v3680_v56 }
 0x222   :  { %3302 = vmatpush3.bf16.msra.mxu1 %v3680_v56 }
 0x223   :  { %3303 = vmatprep.subr.bf16.mxu1 %v3681_v43 }
 0x226   :  { %3304 = vmatpush3.bf16.msra.mxu1 %v3681_v43 }
 0x227   :  { %3305 = vmatprep.subr.bf16.mxu1 %v3682_v36 }
 0x22a   :  { %3306 = vmatpush3.bf16.msra.mxu1 %v3682_v36 }
 0x294   :  { %v3277_v47 = vpop.f32.mrb[32].mxu0 }
 0x295   :  { %v2460_v48 = vpop.f32.mrb[33].mxu0 }
 0x296   :  { %v3278_v16 = vpop.f32.mrb[34].mxu0 }
 0x297   :  { %v2463_v54 = vpop.f32.mrb[35].mxu0 }
 0x29c   :  { %v3281_v18 = vpop.f32.mrb[36].mxu0 }
 0x29d   :  { %v2476_v41 = vpop.f32.mrb[37].mxu0 }
 0x29e   :  { %v3282_v0 = vpop.f32.mrb[38].mxu0 }
 0x29f   :  { %v2479_v52 = vpop.f32.mrb[39].mxu0 }
 0x2a4   :  { %v4983_v21 = vpop.f32.mrb[40].mxu0 }
 0x2a5   :  { %v4985_v53 = vpop.f32.mrb[41].mxu0 }
 0x2a6   :  { %v4987_v57 = vpop.f32.mrb[42].mxu0 }
 0x2a7   :  { %v4989_v8 = vpop.f32.mrb[43].mxu0 }
 0x2ac   :  { %v4991_v58 = vpop.f32.mrb[44].mxu0 }
 0x2ad   :  { %v4993_v55 = vpop.f32.mrb[45].mxu0 }
 0x2ae   :  { %v4995_v46 = vpop.f32.mrb[46].mxu0 }
 0x2af   :  { %v4997_v60 = vpop.f32.mrb[47].mxu0 }
 0x2b3   :  { %v3161_v32 = vpop.f32.mrb[112].mxu1 }
 0x2b4   :  { %v3162_v2 = vpop.f32.mrb[113].mxu1 }
 0x2b5   :  { %v3163_v61 = vadd.f32 %v3162_v2, %v3161_v32  ;;  %v3164_v3 = vpop.f32.mrb[114].mxu1 }
 0x2b6   :  { %v3165_v22 = vpop.f32.mrb[115].mxu1 }
 0x2b7   :  { %v2364_v6 = vadd.f32 %v3163_v61, %v5002_v33  ;;  %v3166_v25 = vadd.f32 %v3165_v22, %v3164_v3 }
 0x2b9   :  { %v2461_v9 = vadd.f32 %v2460_v48, %v2364_v6  ;;  %v2367_v59 = vadd.f32 %v3166_v25, %v5002_v33 }
 0x2bb   :  { %v2464_v42 = vadd.f32 %v2463_v54, %v2367_v59  ;;  %v3167_v11 = vpop.f32.mrb[116].mxu1  ;;  %v2523_v62 = vmax.f32 %v2461_v9, 0.0 }
 0x2bc   :  { %v3168_v44 = vpop.f32.mrb[117].mxu1 }
 0x2bd   :  { %v2524_v12 = vmax.f32 %v2464_v42, 0.0  ;;  %v3169_v49 = vadd.f32 %v3168_v44, %v3167_v11  ;;  %v3170_v63 = vpop.f32.mrb[118].mxu1 }
 0x2be   :  { %v3171_v14 = vpop.f32.mrb[119].mxu1 }
 0x2bf   :  { %v2372_v19 = vadd.f32 %v3169_v49, %v5002_v33  ;;  %v3172_v15 = vadd.f32 %v3171_v14, %v3170_v63  ;;  %v2539_v4 = vpack.c.bf16 %v2524_v12, %v2523_v62 }
 0x2c1   :  { %v2469_v7 = vadd.f32 %v3277_v47, %v2372_v19  ;;  %v2375_v23 = vadd.f32 %v3172_v15, %v5002_v33  ;;  %3307 = vmatprep.mubr.bf16.mxu1 %v2539_v4 }
 0x2c3   :  { %v2472_v24 = vadd.f32 %v3278_v16, %v2375_v23  ;;  %v3173_v26 = vpop.f32.mrb[120].mxu1  ;;  %v2525_v17 = vmax.f32 %v2469_v7, 0.0 }
 0x2c4   :  { %v3174_v29 = vpop.f32.mrb[121].mxu1 }
 0x2c5   :  { %v2526_v1 = vmax.f32 %v2472_v24, 0.0  ;;  %v3175_v27 = vadd.f32 %v3174_v29, %v3173_v26  ;;  %v3176_v20 = vpop.f32.mrb[122].mxu1 }
 0x2c6   :  { %v3177_v28 = vpop.f32.mrb[123].mxu1 }
 0x2c7   :  { %v2540_v30 = vpack.c.bf16 %v2526_v1, %v2525_v17  ;;  %v2380_v5 = vadd.f32 %v3175_v27, %v5002_v33  ;;  %v3178_v31 = vadd.f32 %v3177_v28, %v3176_v20 }
 0x2c9   :  { %v2477_v10 = vadd.f32 %v2476_v41, %v2380_v5  ;;  %v2383_v35 = vadd.f32 %v3178_v31, %v5002_v33  ;;  %3308 = vmatmul.mubr.bf16.vlgmr.msra.gmra.mrb[144].mxu1 %v2540_v30 }
 0x2cb   :  { %v2480_v13 = vadd.f32 %v2479_v52, %v2383_v35  ;;  %v3179_v38 = vpop.f32.mrb[124].mxu1  ;;  %v2527_v51 = vmax.f32 %v2477_v10, 0.0 }
 0x2cc   :  { %v3180_v37 = vpop.f32.mrb[125].mxu1 }
 0x2cd   :  { %v2528_v34 = vmax.f32 %v2480_v13, 0.0  ;;  %v3181_v45 = vadd.f32 %v3180_v37, %v3179_v38  ;;  %v3182_v50 = vpop.f32.mrb[126].mxu1 }
 0x2ce   :  { %v3183_v39 = vpop.f32.mrb[127].mxu1 }
 0x2cf   :  { %v2388_v40 = vadd.f32 %v3181_v45, %v5002_v33  ;;  %v3184_v56 = vadd.f32 %v3183_v39, %v3182_v50  ;;  %v2541_v43 = vpack.c.bf16 %v2528_v34, %v2527_v51 }
 0x2d1   :  { %v2485_v36 = vadd.f32 %v3281_v18, %v2388_v40  ;;  %v2391_v47 = vadd.f32 %v3184_v56, %v5002_v33  ;;  %3311 = vmatprep.mubr.bf16.mxu1 %v2541_v43  ;;  %v2935_v40 = vld [vmem:[%s5049_s6] ss:$0 sm:$0xff]  ;;  %s3708_s6 = smov [#allocation2]  }
 0x2d2   :  { %s2736_s23 = sshll.u32 %s3708_s6, 4  ;;  %s2737_s23 = int_to_ptr.vmem [resolvable:$true] %s2736_s23 }
 0x2d3   :  { %v2488_v48 = vadd.f32 %v3282_v0, %v2391_v47  ;;  %v3185_v16 = vpop.f32.mrb[128].mxu1  ;;  %v2529_v41 = vmax.f32 %v2485_v36, 0.0  ;;  %s3683_s24 = scalar_lea.vmem %s2737_s23, 2048  ;;  %p3688_p1 = scmp.lt.s32.totalorder %s2737_s23, %s2737_s23 }
 0x2d4   :  { %v3186_v54 = vpop.f32.mrb[129].mxu1  ;;  %p3684_p0 = scmp.ne.s32.totalorder %s2737_s23, %s3683_s24  ;;  %p3689_p2 = scmp.lt.s32.totalorder %s3683_s24, %s3683_s24 }
 0x2d5   :  { %v2530_v52 = vmax.f32 %v2488_v48, 0.0  ;;  %v3187_v32 = vadd.f32 %v3186_v54, %v3185_v16  ;;  %v3188_v2 = vpop.f32.mrb[130].mxu1 }
 0x2d6   :  { %v3189_v61 = vpop.f32.mrb[131].mxu1  ;;  %p3690_p3 = por %p3689_p2, %p3688_p1 }
 0x2d7   :  { %v2396_v3 = vadd.f32 %v3187_v32, %v5002_v33  ;;  %v3190_v22 = vadd.f32 %v3189_v61, %v3188_v2  ;;  %v2542_v6 = vpack.c.bf16 %v2530_v52, %v2529_v41 }
 0x2d8   :  { %p3691_p4 = pnand %p3690_p3, %p3684_p0 }
 0x2d9   :  { %v2493_v25 = vadd.f32 %v4985_v53, %v2396_v3  ;;  %v2399_v9 = vadd.f32 %v3190_v22, %v5002_v33  ;;  %3312 = vmatmul.mubr.bf16.gmra.mrb[148].mxu1 %v2542_v6 }
 0x2db   :  { %v2496_v18 = vadd.f32 %v4989_v8, %v2399_v9  ;;  %v3191_v59 = vpop.f32.mrb[132].mxu1  ;;  %v2531_v42 = vmax.f32 %v2493_v25, 0.0 }
 0x2dc   :  { %v3192_v0 = vpop.f32.mrb[133].mxu1 }
 0x2dd   :  { %v2532_v11 = vmax.f32 %v2496_v18, 0.0  ;;  %v3193_v44 = vadd.f32 %v3192_v0, %v3191_v59  ;;  %v3194_v62 = vpop.f32.mrb[134].mxu1 }
 0x2de   :  { %v3195_v12 = vpop.f32.mrb[135].mxu1 }
 0x2df   :  { %v2404_v49 = vadd.f32 %v3193_v44, %v5002_v33  ;;  %v3196_v63 = vadd.f32 %v3195_v12, %v3194_v62  ;;  %v2543_v14 = vpack.c.bf16 %v2532_v11, %v2531_v42 }
 0x2e1   :  { %v2501_v19 = vadd.f32 %v4983_v21, %v2404_v49  ;;  %v2407_v53 = vadd.f32 %v3196_v63, %v5002_v33  ;;  %3315 = vmatprep.mubr.bf16.mxu1 %v2543_v14 }
 0x2e3   :  { %v2504_v15 = vadd.f32 %v4987_v57, %v2407_v53  ;;  %v3197_v4 = vpop.f32.mrb[136].mxu1  ;;  %v2533_v7 = vmax.f32 %v2501_v19, 0.0 }
 0x2e4   :  { %v3198_v8 = vpop.f32.mrb[137].mxu1 }
 0x2e5   :  { %v2534_v23 = vmax.f32 %v2504_v15, 0.0  ;;  %v3199_v24 = vadd.f32 %v3198_v8, %v3197_v4  ;;  %v3200_v26 = vpop.f32.mrb[138].mxu1 }
 0x2e6   :  { %v3201_v29 = vpop.f32.mrb[139].mxu1 }
 0x2e7   :  { %v2412_v17 = vadd.f32 %v3199_v24, %v5002_v33  ;;  %v3202_v1 = vadd.f32 %v3201_v29, %v3200_v26  ;;  %v2544_v27 = vpack.c.bf16 %v2534_v23, %v2533_v7 }
 0x2e9   :  { %v2509_v20 = vadd.f32 %v4993_v55, %v2412_v17  ;;  %v2415_v21 = vadd.f32 %v3202_v1, %v5002_v33  ;;  %3316 = vmatmul.mubr.bf16.gmra.mrb[152].mxu1 %v2544_v27 }
 0x2eb   :  { %v2512_v28 = vadd.f32 %v4997_v60, %v2415_v21  ;;  %v3203_v30 = vpop.f32.mrb[140].mxu1  ;;  %v2535_v5 = vmax.f32 %v2509_v20, 0.0 }
 0x2ec   :  { %v3204_v57 = vpop.f32.mrb[141].mxu1 }
 0x2ed   :  { %v2536_v31 = vmax.f32 %v2512_v28, 0.0  ;;  %v3205_v10 = vadd.f32 %v3204_v57, %v3203_v30  ;;  %v3206_v35 = vpop.f32.mrb[142].mxu1 }
 0x2ee   :  { %v3207_v13 = vpop.f32.mrb[143].mxu1 }
 0x2ef   :  { %v2420_v38 = vadd.f32 %v3205_v10, %v5002_v33  ;;  %v3208_v37 = vadd.f32 %v3207_v13, %v3206_v35  ;;  %v2545_v51 = vpack.c.bf16 %v2536_v31, %v2535_v5 }
 0x2f1   :  { %v2517_v34 = vadd.f32 %v4991_v58, %v2420_v38  ;;  %v2423_v55 = vadd.f32 %v3208_v37, %v5002_v33  ;;  %3319 = vmatprep.mubr.bf16.mxu1 %v2545_v51 }
 0x2f3   :  { %v2520_v45 = vadd.f32 %v4995_v46, %v2423_v55  ;;  %v2537_v50 = vmax.f32 %v2517_v34, 0.0 }
 0x2f5   :  { %v2538_v60 = vmax.f32 %v2520_v45, 0.0 }
 0x2f7   :  { %v2546_v39 = vpack.c.bf16 %v2538_v60, %v2537_v50 }
 0x2f9   :  { %3320 = vmatmul.mubr.bf16.gmra.mrb[156].mxu1 %v2546_v39 }
 0x39c   :  { %v3309_v56 = vpop.f32.mrb[144].mxu1 }
 0x39d   :  { %v2661_v43 = vadd.f32 %v3309_v56, %v2935_v40  ;;  %v2652_v36 = vpop.f32.mrb[145].mxu1 }
 0x39e   :  { %v2653_v47 = vadd.f32 %v2935_v40, %v2652_v36  ;;  %v3310_v48 = vpop.f32.mrb[146].mxu1 }
 0x39f   :  { %2717 = vst [vmem:[#allocation2 + $0x10] sm:$0xff] %v2661_v43  ;;  %v2664_v58 = vadd.f32 %v3310_v48, %v2935_v40  ;;  %v2655_v16 = vpop.f32.mrb[147].mxu1 }
 0x3a0   :  { %2715 = vst [vmem:[#allocation2] sm:$0xff] %v2653_v47  ;;  %v2656_v33 = vadd.f32 %v2935_v40, %v2655_v16 }
 0x3a1   :  { %2718 = vst [vmem:[#allocation2 + $0x18] sm:$0xff] %v2664_v58 }
 0x3a2   :  { %2716 = vst [vmem:[#allocation2 + $0x8] sm:$0xff] %v2656_v33 }
 0x3ac   :  { %v3313_v46 = vpop.f32.mrb[148].mxu1 }
 0x3ad   :  { %v2677_v54 = vadd.f32 %v3313_v46, %v2935_v40  ;;  %v2668_v41 = vpop.f32.mrb[149].mxu1 }
 0x3ae   :  { %v2669_v52 = vadd.f32 %v2935_v40, %v2668_v41  ;;  %v3314_v32 = vpop.f32.mrb[150].mxu1 }
 0x3af   :  { %2721 = vst [vmem:[#allocation2 + $0x30] sm:$0xff] %v2677_v54  ;;  %v2680_v2 = vadd.f32 %v3314_v32, %v2935_v40  ;;  %v2671_v61 = vpop.f32.mrb[151].mxu1 }
 0x3b0   :  { %2719 = vst [vmem:[#allocation2 + $0x20] sm:$0xff] %v2669_v52  ;;  %v2672_v3 = vadd.f32 %v2935_v40, %v2671_v61 }
 0x3b1   :  { %2722 = vst [vmem:[#allocation2 + $0x38] sm:$0xff] %v2680_v2 }
 0x3b2   :  { %2720 = vst [vmem:[#allocation2 + $0x28] sm:$0xff] %v2672_v3 }
 0x3bc   :  { %v3317_v22 = vpop.f32.mrb[152].mxu1 }
 0x3bd   :  { %v2693_v6 = vadd.f32 %v3317_v22, %v2935_v40  ;;  %v2684_v25 = vpop.f32.mrb[153].mxu1 }
 0x3be   :  { %v2685_v9 = vadd.f32 %v2935_v40, %v2684_v25  ;;  %v3318_v18 = vpop.f32.mrb[154].mxu1 }
 0x3bf   :  { %2725 = vst [vmem:[#allocation2 + $0x50] sm:$0xff] %v2693_v6  ;;  %v2696_v59 = vadd.f32 %v3318_v18, %v2935_v40  ;;  %v2687_v0 = vpop.f32.mrb[155].mxu1 }
 0x3c0   :  { %2723 = vst [vmem:[#allocation2 + $0x40] sm:$0xff] %v2685_v9  ;;  %v2688_v42 = vadd.f32 %v2935_v40, %v2687_v0 }
 0x3c1   :  { %2726 = vst [vmem:[#allocation2 + $0x58] sm:$0xff] %v2696_v59 }
 0x3c2   :  { %2724 = vst [vmem:[#allocation2 + $0x48] sm:$0xff] %v2688_v42 }
 0x3cc   :  { %v3321_v11 = vpop.f32.mrb[156].mxu1 }
 0x3cd   :  { %v2709_v44 = vadd.f32 %v3321_v11, %v2935_v40  ;;  %v2700_v62 = vpop.f32.mrb[157].mxu1 }
 0x3ce   :  { %v2701_v12 = vadd.f32 %v2935_v40, %v2700_v62  ;;  %v3322_v49 = vpop.f32.mrb[158].mxu1 }
 0x3cf   :  { %2729 = vst [vmem:[#allocation2 + $0x70] sm:$0xff] %v2709_v44  ;;  %v2712_v63 = vadd.f32 %v3322_v49, %v2935_v40  ;;  %v2703_v14 = vpop.f32.mrb[159].mxu1 }
 0x3d0   :  { %2727 = vst [vmem:[#allocation2 + $0x60] sm:$0xff] %v2701_v12  ;;  %v2704_v19 = vadd.f32 %v2935_v40, %v2703_v14 }
 0x3d1   :  { %2730 = vst [vmem:[#allocation2 + $0x78] sm:$0xff] %v2712_v63 }
 0x3d2   :  { %2728 = vst [vmem:[#allocation2 + $0x68] sm:$0xff] %v2704_v19 }
 0x3d3   :  { %3694 = shalt.err (!%p3691_p4)
}
 0x3d4   :  { %s3695_s27 = scalar_lea.hbm %s5050_s7, 2048 }
 0x3d5   :  { %p3696_p5 = scmp.ne.s32.totalorder %s5050_s7, %s3695_s27  ;;  %p3699_p6 = scmp.lt.u32.totalorder %s3695_s27, %s5050_s7 }
 0x3d7   :  { %p3701_p7 = pnand %p3699_p6, %p3696_p5 }
 0x3d9   :  { %3704 = shalt.err (!%p3701_p7)
}
 0x3da   :  { %s3709_s3 = smov 128   ;;  %s3710_s9 = smov 8  }
 0x3db   :  { %2742 = dma.vmem_to_hbm [thread:$0]  %s2737_s23, 2048, %s5050_s7, [#allocation3], %s3709_s3, %s3709_s3, %s3710_s9  }
 0x3dc   :  { %3705 = dma.done.wait [#allocation3], 2048  }
 0x3dd   :  { %3706 = vsyncadd [#allocation3], 4294965248 }
 0x3de   :  { %2746 = vsyncpa [#allocation3], 1 }

</bundles_post_ra>
